<compile_context>
chip_gen: v7x
topology: tpu7x:2x2x1
jax: 0.10.0
libtpu: 0.0.40
codegen_flags: <defaults>
</compile_context>

<pallas_src>
import jax
import jax.numpy as jnp
from jax.experimental import pallas as pl
from jax.experimental.pallas import tpu as pltpu

# ---- small, forward-consistent config (module defaults scaled down) ----
VOCAB = 65          # vocab_size
VPAD = 128          # lane-dense padded vocab (lm_head output + one-hot width)
N_EMBD = 32         # n_embd
N_HEAD = 4          # n_head
HEAD = N_EMBD // N_HEAD
BLOCK_SIZE = 16     # block_size (max T)
N_LAYER = 2         # n_layer
LN_EPS = 1e-5       # torch.nn.LayerNorm default eps
NEG_BIG = -1e30     # finite "minus infinity" for causal masking


def _layernorm(x, w, b):
    # PyTorch LayerNorm: biased variance over the last dim.
    mu = jnp.mean(x, axis=-1, keepdims=True)
    var = jnp.mean((x - mu) ** 2, axis=-1, keepdims=True)
    return (x - mu) * jax.lax.rsqrt(var + LN_EPS) * w + b


def _norm(x):
    # normalization only; affine folded into lm_head outside the kernel.
    mu = jnp.mean(x, axis=-1, keepdims=True)
    var = jnp.mean((x - mu) ** 2, axis=-1, keepdims=True)
    return (x - mu) * jax.lax.rsqrt(var + LN_EPS)


def fused_forward_kernel(idx_ref, tok_ref, pos_ref, wqkv_ref, wo_ref,
                         w1_ref, w2_ref, vec_ref, b1_ref, lmw_ref, lmb_ref,
                         out_ref):
    B, T, _ = idx_ref.shape
    C = N_EMBD
    BT = B * T
    scale = jnp.float32(C) ** -0.5          # reference scales by n_embd**-0.5

    # ---- fused embedding: one-hot(idx) @ tok_emb  +  pos_emb ----
    ids = idx_ref[...]                                              # (B, T, 1) int32
    cols = jax.lax.broadcasted_iota(jnp.int32, (B, T, VPAD), 2)
    onehot = (cols == ids).astype(jnp.float32)                      # (B, T, VPAD)
    tok = jnp.dot(onehot.reshape(BT, VPAD), tok_ref[...],
                  preferred_element_type=jnp.float32)               # (BT, C)
    x = (tok.reshape(B, T, C) + pos_ref[0:T, :]).reshape(BT, C)     # f32 residual

    # Causal additive bias: built once, shared by every layer/head.
    row = jax.lax.broadcasted_iota(jnp.int32, (T, T), 0)
    col = jax.lax.broadcasted_iota(jnp.int32, (T, T), 1)
    bias = jnp.where(col <= row, 0.0, NEG_BIG).astype(jnp.float32)  # (T, T)

    for l in range(N_LAYER):
        vecs = vec_ref[l]                   # (8, C) packed small params
        ln1w, ln1b = vecs[0:1], vecs[1:2]
        ln2w, ln2b = vecs[2:3], vecs[3:4]
        bo, b2 = vecs[4:5], vecs[5:6]
        b1 = b1_ref[l]                      # (1, 4C)

        # ---- x + MultiHeadAttention(LayerNorm1(x)) ----
        h = _layernorm(x, ln1w, ln1b).astype(jnp.bfloat16)          # (BT, C) bf16
        qkv = jnp.dot(h, wqkv_ref[l],
                      preferred_element_type=jnp.float32)           # (BT, 3C) f32
        qkv_b = qkv.astype(jnp.bfloat16)
        q3 = qkv_b[:, 0 * C:1 * C].reshape(B, T, C)
        k3 = qkv_b[:, 1 * C:2 * C].reshape(B, T, C)
        v3 = qkv_b[:, 2 * C:3 * C].reshape(B, T, C)

        head_outs = []
        for hh in range(N_HEAD):
            s, e = hh * HEAD, (hh + 1) * HEAD
            qh, kh, vh = q3[:, :, s:e], k3[:, :, s:e], v3[:, :, s:e]
            # batched over B: (B,T,HD) x (B,S,HD) -> (B,T,S), f32 accumulation
            sc = jnp.einsum('btd,bsd->bts', qh, kh,
                            preferred_element_type=jnp.float32) * scale
            sc = sc + bias[None, :, :]
            sc = sc - jnp.max(sc, axis=-1, keepdims=True)
            ex = jnp.exp(sc)
            wei = ex * pl.reciprocal(jnp.sum(ex, axis=-1, keepdims=True),
                                     approx=True)
            # TODO(synk): attention/output Dropout layers are identity (eval-mode forward).
            head_outs.append(jnp.einsum('bts,bsd->btd', wei.astype(jnp.bfloat16),
                                        vh, preferred_element_type=jnp.float32))
        # concat heads once, then a single K=32 output-projection matmul.
        attn = jnp.concatenate(head_outs, axis=-1).reshape(BT, C)   # (BT, C) f32
        proj = jnp.dot(attn.astype(jnp.bfloat16), wo_ref[l],
                       preferred_element_type=jnp.float32) + bo
        x = x + proj

        # ---- x + FeedForward(LayerNorm2(x)) ----
        h2 = _layernorm(x, ln2w, ln2b).astype(jnp.bfloat16)
        f = jnp.dot(h2, w1_ref[l], preferred_element_type=jnp.float32) + b1
        f = jnp.maximum(f, 0.0).astype(jnp.bfloat16)
        f = jnp.dot(f, w2_ref[l], preferred_element_type=jnp.float32) + b2
        x = x + f

    # ---- final LayerNorm (affine folded into lm_head) + lm_head ----
    hf = _norm(x).astype(jnp.bfloat16)
    out_ref[...] = jnp.dot(hf, lmw_ref[...],
                           preferred_element_type=jnp.float32) + lmb_ref[...]


def fused_forward(idx3, params):
    B, T, _ = idx3.shape
    vspec = pl.BlockSpec(memory_space=pltpu.MemorySpace.VMEM)
    args = (idx3, params['tok_emb'], params['pos_emb'], params['wqkv'],
            params['wo'], params['w1'], params['w2'], params['vecs'],
            params['b1'], params['lm_w'], params['lm_b'])
    return pl.pallas_call(
        fused_forward_kernel,
        out_shape=jax.ShapeDtypeStruct((B * T, VPAD), jnp.float32),
        in_specs=[vspec] * len(args),
        out_specs=vspec,
        # explicit, generation-safe VMEM budget (fits v7x's 64 MiB physical).
        compiler_params=pltpu.CompilerParams(
            vmem_limit_bytes=16 * 1024 * 1024),
    )(*args)


def init_params(key):
    keys = iter(jax.random.split(key, 16))

    def w(shape, scale=0.02):
        return (scale * jax.random.normal(next(keys), shape)).astype(jnp.float32)

    C = N_EMBD
    # packed per-layer small vectors: rows 0 ln1_w, 1 ln1_b, 2 ln2_w, 3 ln2_b,
    # 4 proj bias, 5 ffn out bias, 6-7 padding (sublane alignment).
    vecs = jnp.zeros((N_LAYER, 8, C), jnp.float32)
    vecs = vecs.at[:, 0, :].set(1.0)
    vecs = vecs.at[:, 2, :].set(1.0)

    # token embedding padded to VPAD rows so the in-kernel one-hot matmul is lane-dense.
    tok_emb = jnp.zeros((VPAD, C), jnp.float32).at[:VOCAB, :].set(w((VOCAB, C)))

    # fold final-LayerNorm affine (gamma, beta) into lm_head: W' = gamma[:,None]*W,
    # b' = b + beta @ W.  (gamma=1, beta=0 at init, but the fold is done generally.)
    gamma = jnp.ones((C,), jnp.float32)
    beta = jnp.zeros((C,), jnp.float32)
    lm_w_raw = jnp.zeros((C, VPAD), jnp.float32).at[:, :VOCAB].set(w((C, VOCAB)))
    lm_b_raw = jnp.zeros((1, VPAD), jnp.float32)
    lm_w = (gamma[:, None] * lm_w_raw).astype(jnp.bfloat16)
    lm_b = lm_b_raw + beta[None, :] @ lm_w_raw

    return {
        'tok_emb': tok_emb,                                   # (VPAD, C) f32
        'pos_emb': w((BLOCK_SIZE, C)),                        # (block_size, C) f32
        'wqkv': w((N_LAYER, C, 3 * C)).astype(jnp.bfloat16),  # fused Wq|Wk|Wv
        'wo':   w((N_LAYER, C, C)).astype(jnp.bfloat16),
        'w1':   w((N_LAYER, C, 4 * C)).astype(jnp.bfloat16),
        'w2':   w((N_LAYER, 4 * C, C)).astype(jnp.bfloat16),
        'vecs': vecs,
        'b1':   jnp.zeros((N_LAYER, 1, 4 * C), jnp.float32),
        'lm_w': lm_w,                                         # (C, VPAD) bf16
        'lm_b': lm_b,                                         # (1, VPAD) f32
    }


@jax.jit
def model_forward(params, idx):
    B, T = idx.shape
    idx3 = idx.astype(jnp.int32).reshape(B, T, 1)     # metadata-only reshape
    logits_flat = fused_forward(idx3, params)         # (B*T, VPAD), lane-dense store
    # TODO(synk): cross-entropy loss path (targets != None) not implemented;
    # forward with targets=None returns (logits, None), which this reproduces.
    return logits_flat.reshape(B, T, VPAD)[:, :, :VOCAB]


if __name__ == "__main__":
    key = jax.random.PRNGKey(0)
    k_idx, k_params = jax.random.split(key)

    B, T = 2, 8
    idx = jax.random.randint(k_idx, (B, T), 0, VOCAB, dtype=jnp.int32)
    params = init_params(k_params)

    logits = model_forward(params, idx)
    jax.block_until_ready(logits)

    assert logits.shape == (B, T, VOCAB), logits.shape
    assert logits.dtype == jnp.float32
    assert bool(jnp.all(jnp.isfinite(logits)))
    print("KERNEL_OK")
</pallas_src>

<mosaic_0001>
module attributes {stable_mosaic.version = 11 : i64} {
  func.func @fused_forward_kernel(%arg0: memref<2x8x1xi32, #tpu.memory_space<vmem>>, %arg1: memref<128x32xf32, #tpu.memory_space<vmem>>, %arg2: memref<16x32xf32, #tpu.memory_space<vmem>>, %arg3: memref<2x32x96xbf16, #tpu.memory_space<vmem>>, %arg4: memref<2x32x32xbf16, #tpu.memory_space<vmem>>, %arg5: memref<2x32x128xbf16, #tpu.memory_space<vmem>>, %arg6: memref<2x128x32xbf16, #tpu.memory_space<vmem>>, %arg7: memref<2x8x32xf32, #tpu.memory_space<vmem>>, %arg8: memref<2x1x128xf32, #tpu.memory_space<vmem>>, %arg9: memref<32x128xbf16, #tpu.memory_space<vmem>>, %arg10: memref<1x128xf32, #tpu.memory_space<vmem>>, %arg11: memref<16x128xf32, #tpu.memory_space<vmem>>) attributes {dimension_semantics = [], scalar_prefetch = 0 : i64, scratch_operands = 0 : i64, tpu.core_type = #tpu.core_type<tc>} {
    %cst = arith.constant 3.200000e+01 : f32
    %cst_0 = arith.constant -5.000000e-01 : f32
    %0 = math.powf %cst, %cst_0 : f32
    %c0 = arith.constant 0 : index
    %c0_1 = arith.constant 0 : index
    %c0_2 = arith.constant 0 : index
    %1 = vector.load %arg0[%c0, %c0_1, %c0_2] : memref<2x8x1xi32, #tpu.memory_space<vmem>>, vector<2x8x1xi32>
    %2 = tpu.iota {dimensions = array<i32: 2>} : vector<2x8x128xi32>
    %3 = vector.broadcast %1 : vector<2x8x1xi32> to vector<2x8x128xi32>
    %4 = arith.cmpi eq, %2, %3 : vector<2x8x128xi32>
    %5 = arith.extui %4 : vector<2x8x128xi1> to vector<2x8x128xi32>
    %6 = arith.sitofp %5 : vector<2x8x128xi32> to vector<2x8x128xf32>
    %7 = vector.shape_cast %6 : vector<2x8x128xf32> to vector<16x128xf32>
    %c0_3 = arith.constant 0 : index
    %c0_4 = arith.constant 0 : index
    %8 = vector.load %arg1[%c0_3, %c0_4] : memref<128x32xf32, #tpu.memory_space<vmem>>, vector<128x32xf32>
    %cst_5 = arith.constant dense<0.000000e+00> : vector<16x32xf32>
    %9 = tpu.matmul %7, %8, %cst_5 {dimension_numbers = #tpu.dot_dimension_numbers<[1], [0], [0], [1], [0, 0, 1, 1], [], []>} : vector<16x128xf32>, vector<128x32xf32>, vector<16x32xf32> -> vector<16x32xf32>
    %10 = vector.shape_cast %9 : vector<16x32xf32> to vector<2x8x32xf32>
    %c0_6 = arith.constant 0 : index
    %c0_7 = arith.constant 0 : index
    %11 = vector.load %arg2[%c0_6, %c0_7] : memref<16x32xf32, #tpu.memory_space<vmem>>, vector<8x32xf32>
    %12 = vector.shape_cast %11 : vector<8x32xf32> to vector<1x8x32xf32>
    %13 = vector.broadcast %12 : vector<1x8x32xf32> to vector<2x8x32xf32>
    %14 = arith.addf %10, %13 : vector<2x8x32xf32>
    %15 = vector.shape_cast %14 : vector<2x8x32xf32> to vector<16x32xf32>
    %16 = tpu.iota {dimensions = array<i32: 0>} : vector<8x8xi32>
    %17 = tpu.iota {dimensions = array<i32: 1>} : vector<8x8xi32>
    %18 = arith.cmpi sle, %17, %16 : vector<8x8xi32>
    %cst_8 = arith.constant 0.000000e+00 : f32
    %cst_9 = arith.constant -1.000000e+30 : f32
    %19 = vector.broadcast %cst_8 : f32 to vector<8x8xf32>
    %20 = vector.broadcast %cst_9 : f32 to vector<8x8xf32>
    %21 = arith.select %18, %19, %20 : vector<8x8xi1>, vector<8x8xf32>
    %c0_10 = arith.constant 0 : index
    %c0_11 = arith.constant 0 : index
    %c0_12 = arith.constant 0 : index
    %22 = vector.load %arg7[%c0_10, %c0_11, %c0_12] : memref<2x8x32xf32, #tpu.memory_space<vmem>>, vector<1x8x32xf32>
    %23 = vector.shape_cast %22 : vector<1x8x32xf32> to vector<8x32xf32>
    %24 = vector.extract_strided_slice %23 {offsets = [0, 0], sizes = [1, 32], strides = [1, 1]} : vector<8x32xf32> to vector<1x32xf32>
    %25 = vector.extract_strided_slice %23 {offsets = [1, 0], sizes = [1, 32], strides = [1, 1]} : vector<8x32xf32> to vector<1x32xf32>
    %26 = vector.extract_strided_slice %23 {offsets = [2, 0], sizes = [1, 32], strides = [1, 1]} : vector<8x32xf32> to vector<1x32xf32>
    %27 = vector.extract_strided_slice %23 {offsets = [3, 0], sizes = [1, 32], strides = [1, 1]} : vector<8x32xf32> to vector<1x32xf32>
    %28 = vector.extract_strided_slice %23 {offsets = [4, 0], sizes = [1, 32], strides = [1, 1]} : vector<8x32xf32> to vector<1x32xf32>
    %29 = vector.extract_strided_slice %23 {offsets = [5, 0], sizes = [1, 32], strides = [1, 1]} : vector<8x32xf32> to vector<1x32xf32>
    %c0_13 = arith.constant 0 : index
    %c0_14 = arith.constant 0 : index
    %c0_15 = arith.constant 0 : index
    %30 = vector.load %arg8[%c0_13, %c0_14, %c0_15] : memref<2x1x128xf32, #tpu.memory_space<vmem>>, vector<1x1x128xf32>
    %31 = vector.shape_cast %30 : vector<1x1x128xf32> to vector<1x128xf32>
    %cst_16 = arith.constant dense<0.000000e+00> : vector<16xf32>
    %32 = vector.multi_reduction <add>, %15, %cst_16 [1] : vector<16x32xf32> to vector<16xf32>
    %33 = vector.shape_cast %32 : vector<16xf32> to vector<16x1xf32>
    %cst_17 = arith.constant 3.200000e+01 : f32
    %34 = vector.broadcast %cst_17 : f32 to vector<16x1xf32>
    %35 = arith.divf %33, %34 : vector<16x1xf32>
    %36 = vector.broadcast %35 : vector<16x1xf32> to vector<16x32xf32>
    %37 = arith.subf %15, %36 : vector<16x32xf32>
    %38 = arith.mulf %37, %37 : vector<16x32xf32>
    %cst_18 = arith.constant dense<0.000000e+00> : vector<16xf32>
    %39 = vector.multi_reduction <add>, %38, %cst_18 [1] : vector<16x32xf32> to vector<16xf32>
    %40 = vector.shape_cast %39 : vector<16xf32> to vector<16x1xf32>
    %cst_19 = arith.constant 3.200000e+01 : f32
    %41 = vector.broadcast %cst_19 : f32 to vector<16x1xf32>
    %42 = arith.divf %40, %41 : vector<16x1xf32>
    %43 = vector.broadcast %35 : vector<16x1xf32> to vector<16x32xf32>
    %44 = arith.subf %15, %43 : vector<16x32xf32>
    %cst_20 = arith.constant 9.99999974E-6 : f32
    %45 = vector.broadcast %cst_20 : f32 to vector<16x1xf32>
    %46 = arith.addf %42, %45 : vector<16x1xf32>
    %47 = math.rsqrt %46 : vector<16x1xf32>
    %48 = vector.broadcast %47 : vector<16x1xf32> to vector<16x32xf32>
    %49 = arith.mulf %44, %48 : vector<16x32xf32>
    %50 = vector.broadcast %24 : vector<1x32xf32> to vector<16x32xf32>
    %51 = arith.mulf %49, %50 : vector<16x32xf32>
    %52 = vector.broadcast %25 : vector<1x32xf32> to vector<16x32xf32>
    %53 = arith.addf %51, %52 : vector<16x32xf32>
    %54 = arith.truncf %53 : vector<16x32xf32> to vector<16x32xbf16>
    %c0_21 = arith.constant 0 : index
    %c0_22 = arith.constant 0 : index
    %c0_23 = arith.constant 0 : index
    %55 = vector.load %arg3[%c0_21, %c0_22, %c0_23] : memref<2x32x96xbf16, #tpu.memory_space<vmem>>, vector<1x32x96xbf16>
    %56 = vector.shape_cast %55 : vector<1x32x96xbf16> to vector<32x96xbf16>
    %cst_24 = arith.constant dense<0.000000e+00> : vector<16x96xf32>
    %57 = tpu.matmul %54, %56, %cst_24 {dimension_numbers = #tpu.dot_dimension_numbers<[1], [0], [0], [1], [0, 0, 1, 1], [], []>} : vector<16x32xbf16>, vector<32x96xbf16>, vector<16x96xf32> -> vector<16x96xf32>
    %58 = arith.truncf %57 : vector<16x96xf32> to vector<16x96xbf16>
    %59 = vector.extract_strided_slice %58 {offsets = [0, 0], sizes = [16, 32], strides = [1, 1]} : vector<16x96xbf16> to vector<16x32xbf16>
    %60 = vector.shape_cast %59 : vector<16x32xbf16> to vector<2x8x32xbf16>
    %61 = vector.extract_strided_slice %58 {offsets = [0, 32], sizes = [16, 32], strides = [1, 1]} : vector<16x96xbf16> to vector<16x32xbf16>
    %62 = vector.shape_cast %61 : vector<16x32xbf16> to vector<2x8x32xbf16>
    %63 = vector.extract_strided_slice %58 {offsets = [0, 64], sizes = [16, 32], strides = [1, 1]} : vector<16x96xbf16> to vector<16x32xbf16>
    %64 = vector.shape_cast %63 : vector<16x32xbf16> to vector<2x8x32xbf16>
    %65 = vector.extract_strided_slice %60 {offsets = [0, 0, 0], sizes = [2, 8, 8], strides = [1, 1, 1]} : vector<2x8x32xbf16> to vector<2x8x8xbf16>
    %66 = vector.extract_strided_slice %62 {offsets = [0, 0, 0], sizes = [2, 8, 8], strides = [1, 1, 1]} : vector<2x8x32xbf16> to vector<2x8x8xbf16>
    %67 = vector.extract_strided_slice %64 {offsets = [0, 0, 0], sizes = [2, 8, 8], strides = [1, 1, 1]} : vector<2x8x32xbf16> to vector<2x8x8xbf16>
    "tpu.trace_start"() <{level = 10 : i32, message = "btd,bsd->bts"}> : () -> ()
    %cst_25 = arith.constant dense<0.000000e+00> : vector<2x8x8xf32>
    %68 = tpu.matmul %65, %66, %cst_25 {dimension_numbers = #tpu.dot_dimension_numbers<[2], [2], [1], [1], [0, 0, 0, 1, 1, 1], [0], [0]>} : vector<2x8x8xbf16>, vector<2x8x8xbf16>, vector<2x8x8xf32> -> vector<2x8x8xf32>
    "tpu.trace_stop"() : () -> ()
    %69 = vector.broadcast %0 : f32 to vector<2x8x8xf32>
    %70 = arith.mulf %68, %69 : vector<2x8x8xf32>
    %71 = vector.shape_cast %21 : vector<8x8xf32> to vector<1x8x8xf32>
    %72 = vector.broadcast %71 : vector<1x8x8xf32> to vector<2x8x8xf32>
    %73 = arith.addf %70, %72 : vector<2x8x8xf32>
    %cst_26 = arith.constant dense<0xFF800000> : vector<2x8xf32>
    %74 = vector.multi_reduction <maximumf>, %73, %cst_26 [2] : vector<2x8x8xf32> to vector<2x8xf32>
    %75 = vector.shape_cast %74 : vector<2x8xf32> to vector<2x8x1xf32>
    %76 = vector.broadcast %75 : vector<2x8x1xf32> to vector<2x8x8xf32>
    %77 = arith.subf %73, %76 : vector<2x8x8xf32>
    %78 = math.exp %77 : vector<2x8x8xf32>
    %cst_27 = arith.constant dense<0.000000e+00> : vector<2x8xf32>
    %79 = vector.multi_reduction <add>, %78, %cst_27 [2] : vector<2x8x8xf32> to vector<2x8xf32>
    %80 = vector.shape_cast %79 : vector<2x8xf32> to vector<2x8x1xf32>
    %81 = tpu.reciprocal %80 {approx = true} : vector<2x8x1xf32> -> vector<2x8x1xf32>
    %82 = vector.broadcast %81 : vector<2x8x1xf32> to vector<2x8x8xf32>
    %83 = arith.mulf %78, %82 : vector<2x8x8xf32>
    %84 = arith.truncf %83 : vector<2x8x8xf32> to vector<2x8x8xbf16>
    "tpu.trace_start"() <{level = 10 : i32, message = "bts,bsd->btd"}> : () -> ()
    %cst_28 = arith.constant dense<0.000000e+00> : vector<2x8x8xf32>
    %85 = tpu.matmul %84, %67, %cst_28 {dimension_numbers = #tpu.dot_dimension_numbers<[2], [1], [1], [2], [0, 0, 0, 1, 1, 2], [0], [0]>} : vector<2x8x8xbf16>, vector<2x8x8xbf16>, vector<2x8x8xf32> -> vector<2x8x8xf32>
    "tpu.trace_stop"() : () -> ()
    %86 = vector.extract_strided_slice %60 {offsets = [0, 0, 8], sizes = [2, 8, 8], strides = [1, 1, 1]} : vector<2x8x32xbf16> to vector<2x8x8xbf16>
    %87 = vector.extract_strided_slice %62 {offsets = [0, 0, 8], sizes = [2, 8, 8], strides = [1, 1, 1]} : vector<2x8x32xbf16> to vector<2x8x8xbf16>
    %88 = vector.extract_strided_slice %64 {offsets = [0, 0, 8], sizes = [2, 8, 8], strides = [1, 1, 1]} : vector<2x8x32xbf16> to vector<2x8x8xbf16>
    "tpu.trace_start"() <{level = 10 : i32, message = "btd,bsd->bts"}> : () -> ()
    %cst_29 = arith.constant dense<0.000000e+00> : vector<2x8x8xf32>
    %89 = tpu.matmul %86, %87, %cst_29 {dimension_numbers = #tpu.dot_dimension_numbers<[2], [2], [1], [1], [0, 0, 0, 1, 1, 1], [0], [0]>} : vector<2x8x8xbf16>, vector<2x8x8xbf16>, vector<2x8x8xf32> -> vector<2x8x8xf32>
    "tpu.trace_stop"() : () -> ()
    %90 = vector.broadcast %0 : f32 to vector<2x8x8xf32>
    %91 = arith.mulf %89, %90 : vector<2x8x8xf32>
    %92 = vector.shape_cast %21 : vector<8x8xf32> to vector<1x8x8xf32>
    %93 = vector.broadcast %92 : vector<1x8x8xf32> to vector<2x8x8xf32>
    %94 = arith.addf %91, %93 : vector<2x8x8xf32>
    %cst_30 = arith.constant dense<0xFF800000> : vector<2x8xf32>
    %95 = vector.multi_reduction <maximumf>, %94, %cst_30 [2] : vector<2x8x8xf32> to vector<2x8xf32>
    %96 = vector.shape_cast %95 : vector<2x8xf32> to vector<2x8x1xf32>
    %97 = vector.broadcast %96 : vector<2x8x1xf32> to vector<2x8x8xf32>
    %98 = arith.subf %94, %97 : vector<2x8x8xf32>
    %99 = math.exp %98 : vector<2x8x8xf32>
    %cst_31 = arith.constant dense<0.000000e+00> : vector<2x8xf32>
    %100 = vector.multi_reduction <add>, %99, %cst_31 [2] : vector<2x8x8xf32> to vector<2x8xf32>
    %101 = vector.shape_cast %100 : vector<2x8xf32> to vector<2x8x1xf32>
    %102 = tpu.reciprocal %101 {approx = true} : vector<2x8x1xf32> -> vector<2x8x1xf32>
    %103 = vector.broadcast %102 : vector<2x8x1xf32> to vector<2x8x8xf32>
    %104 = arith.mulf %99, %103 : vector<2x8x8xf32>
    %105 = arith.truncf %104 : vector<2x8x8xf32> to vector<2x8x8xbf16>
    "tpu.trace_start"() <{level = 10 : i32, message = "bts,bsd->btd"}> : () -> ()
    %cst_32 = arith.constant dense<0.000000e+00> : vector<2x8x8xf32>
    %106 = tpu.matmul %105, %88, %cst_32 {dimension_numbers = #tpu.dot_dimension_numbers<[2], [1], [1], [2], [0, 0, 0, 1, 1, 2], [0], [0]>} : vector<2x8x8xbf16>, vector<2x8x8xbf16>, vector<2x8x8xf32> -> vector<2x8x8xf32>
    "tpu.trace_stop"() : () -> ()
    %107 = vector.extract_strided_slice %60 {offsets = [0, 0, 16], sizes = [2, 8, 8], strides = [1, 1, 1]} : vector<2x8x32xbf16> to vector<2x8x8xbf16>
    %108 = vector.extract_strided_slice %62 {offsets = [0, 0, 16], sizes = [2, 8, 8], strides = [1, 1, 1]} : vector<2x8x32xbf16> to vector<2x8x8xbf16>
    %109 = vector.extract_strided_slice %64 {offsets = [0, 0, 16], sizes = [2, 8, 8], strides = [1, 1, 1]} : vector<2x8x32xbf16> to vector<2x8x8xbf16>
    "tpu.trace_start"() <{level = 10 : i32, message = "btd,bsd->bts"}> : () -> ()
    %cst_33 = arith.constant dense<0.000000e+00> : vector<2x8x8xf32>
    %110 = tpu.matmul %107, %108, %cst_33 {dimension_numbers = #tpu.dot_dimension_numbers<[2], [2], [1], [1], [0, 0, 0, 1, 1, 1], [0], [0]>} : vector<2x8x8xbf16>, vector<2x8x8xbf16>, vector<2x8x8xf32> -> vector<2x8x8xf32>
    "tpu.trace_stop"() : () -> ()
    %111 = vector.broadcast %0 : f32 to vector<2x8x8xf32>
    %112 = arith.mulf %110, %111 : vector<2x8x8xf32>
    %113 = vector.shape_cast %21 : vector<8x8xf32> to vector<1x8x8xf32>
    %114 = vector.broadcast %113 : vector<1x8x8xf32> to vector<2x8x8xf32>
    %115 = arith.addf %112, %114 : vector<2x8x8xf32>
    %cst_34 = arith.constant dense<0xFF800000> : vector<2x8xf32>
    %116 = vector.multi_reduction <maximumf>, %115, %cst_34 [2] : vector<2x8x8xf32> to vector<2x8xf32>
    %117 = vector.shape_cast %116 : vector<2x8xf32> to vector<2x8x1xf32>
    %118 = vector.broadcast %117 : vector<2x8x1xf32> to vector<2x8x8xf32>
    %119 = arith.subf %115, %118 : vector<2x8x8xf32>
    %120 = math.exp %119 : vector<2x8x8xf32>
    %cst_35 = arith.constant dense<0.000000e+00> : vector<2x8xf32>
    %121 = vector.multi_reduction <add>, %120, %cst_35 [2] : vector<2x8x8xf32> to vector<2x8xf32>
    %122 = vector.shape_cast %121 : vector<2x8xf32> to vector<2x8x1xf32>
    %123 = tpu.reciprocal %122 {approx = true} : vector<2x8x1xf32> -> vector<2x8x1xf32>
    %124 = vector.broadcast %123 : vector<2x8x1xf32> to vector<2x8x8xf32>
    %125 = arith.mulf %120, %124 : vector<2x8x8xf32>
    %126 = arith.truncf %125 : vector<2x8x8xf32> to vector<2x8x8xbf16>
    "tpu.trace_start"() <{level = 10 : i32, message = "bts,bsd->btd"}> : () -> ()
    %cst_36 = arith.constant dense<0.000000e+00> : vector<2x8x8xf32>
    %127 = tpu.matmul %126, %109, %cst_36 {dimension_numbers = #tpu.dot_dimension_numbers<[2], [1], [1], [2], [0, 0, 0, 1, 1, 2], [0], [0]>} : vector<2x8x8xbf16>, vector<2x8x8xbf16>, vector<2x8x8xf32> -> vector<2x8x8xf32>
    "tpu.trace_stop"() : () -> ()
    %128 = vector.extract_strided_slice %60 {offsets = [0, 0, 24], sizes = [2, 8, 8], strides = [1, 1, 1]} : vector<2x8x32xbf16> to vector<2x8x8xbf16>
    %129 = vector.extract_strided_slice %62 {offsets = [0, 0, 24], sizes = [2, 8, 8], strides = [1, 1, 1]} : vector<2x8x32xbf16> to vector<2x8x8xbf16>
    %130 = vector.extract_strided_slice %64 {offsets = [0, 0, 24], sizes = [2, 8, 8], strides = [1, 1, 1]} : vector<2x8x32xbf16> to vector<2x8x8xbf16>
    "tpu.trace_start"() <{level = 10 : i32, message = "btd,bsd->bts"}> : () -> ()
    %cst_37 = arith.constant dense<0.000000e+00> : vector<2x8x8xf32>
    %131 = tpu.matmul %128, %129, %cst_37 {dimension_numbers = #tpu.dot_dimension_numbers<[2], [2], [1], [1], [0, 0, 0, 1, 1, 1], [0], [0]>} : vector<2x8x8xbf16>, vector<2x8x8xbf16>, vector<2x8x8xf32> -> vector<2x8x8xf32>
    "tpu.trace_stop"() : () -> ()
    %132 = vector.broadcast %0 : f32 to vector<2x8x8xf32>
    %133 = arith.mulf %131, %132 : vector<2x8x8xf32>
    %134 = vector.shape_cast %21 : vector<8x8xf32> to vector<1x8x8xf32>
    %135 = vector.broadcast %134 : vector<1x8x8xf32> to vector<2x8x8xf32>
    %136 = arith.addf %133, %135 : vector<2x8x8xf32>
    %cst_38 = arith.constant dense<0xFF800000> : vector<2x8xf32>
    %137 = vector.multi_reduction <maximumf>, %136, %cst_38 [2] : vector<2x8x8xf32> to vector<2x8xf32>
    %138 = vector.shape_cast %137 : vector<2x8xf32> to vector<2x8x1xf32>
    %139 = vector.broadcast %138 : vector<2x8x1xf32> to vector<2x8x8xf32>
    %140 = arith.subf %136, %139 : vector<2x8x8xf32>
    %141 = math.exp %140 : vector<2x8x8xf32>
    %cst_39 = arith.constant dense<0.000000e+00> : vector<2x8xf32>
    %142 = vector.multi_reduction <add>, %141, %cst_39 [2] : vector<2x8x8xf32> to vector<2x8xf32>
    %143 = vector.shape_cast %142 : vector<2x8xf32> to vector<2x8x1xf32>
    %144 = tpu.reciprocal %143 {approx = true} : vector<2x8x1xf32> -> vector<2x8x1xf32>
    %145 = vector.broadcast %144 : vector<2x8x1xf32> to vector<2x8x8xf32>
    %146 = arith.mulf %141, %145 : vector<2x8x8xf32>
    %147 = arith.truncf %146 : vector<2x8x8xf32> to vector<2x8x8xbf16>
    "tpu.trace_start"() <{level = 10 : i32, message = "bts,bsd->btd"}> : () -> ()
    %cst_40 = arith.constant dense<0.000000e+00> : vector<2x8x8xf32>
    %148 = tpu.matmul %147, %130, %cst_40 {dimension_numbers = #tpu.dot_dimension_numbers<[2], [1], [1], [2], [0, 0, 0, 1, 1, 2], [0], [0]>} : vector<2x8x8xbf16>, vector<2x8x8xbf16>, vector<2x8x8xf32> -> vector<2x8x8xf32>
    "tpu.trace_stop"() : () -> ()
    %149 = tpu.concatenate %85, %106, %127, %148 in 2 : vector<2x8x8xf32>, vector<2x8x8xf32>, vector<2x8x8xf32>, vector<2x8x8xf32> -> vector<2x8x32xf32>
    %150 = vector.shape_cast %149 : vector<2x8x32xf32> to vector<16x32xf32>
    %151 = arith.truncf %150 : vector<16x32xf32> to vector<16x32xbf16>
    %c0_41 = arith.constant 0 : index
    %c0_42 = arith.constant 0 : index
    %c0_43 = arith.constant 0 : index
    %152 = vector.load %arg4[%c0_41, %c0_42, %c0_43] : memref<2x32x32xbf16, #tpu.memory_space<vmem>>, vector<1x32x32xbf16>
    %153 = vector.shape_cast %152 : vector<1x32x32xbf16> to vector<32x32xbf16>
    %cst_44 = arith.constant dense<0.000000e+00> : vector<16x32xf32>
    %154 = tpu.matmul %151, %153, %cst_44 {dimension_numbers = #tpu.dot_dimension_numbers<[1], [0], [0], [1], [0, 0, 1, 1], [], []>} : vector<16x32xbf16>, vector<32x32xbf16>, vector<16x32xf32> -> vector<16x32xf32>
    %155 = vector.broadcast %28 : vector<1x32xf32> to vector<16x32xf32>
    %156 = arith.addf %154, %155 : vector<16x32xf32>
    %157 = arith.addf %15, %156 : vector<16x32xf32>
    %cst_45 = arith.constant dense<0.000000e+00> : vector<16xf32>
    %158 = vector.multi_reduction <add>, %157, %cst_45 [1] : vector<16x32xf32> to vector<16xf32>
    %159 = vector.shape_cast %158 : vector<16xf32> to vector<16x1xf32>
    %cst_46 = arith.constant 3.200000e+01 : f32
    %160 = vector.broadcast %cst_46 : f32 to vector<16x1xf32>
    %161 = arith.divf %159, %160 : vector<16x1xf32>
    %162 = vector.broadcast %161 : vector<16x1xf32> to vector<16x32xf32>
    %163 = arith.subf %157, %162 : vector<16x32xf32>
    %164 = arith.mulf %163, %163 : vector<16x32xf32>
    %cst_47 = arith.constant dense<0.000000e+00> : vector<16xf32>
    %165 = vector.multi_reduction <add>, %164, %cst_47 [1] : vector<16x32xf32> to vector<16xf32>
    %166 = vector.shape_cast %165 : vector<16xf32> to vector<16x1xf32>
    %cst_48 = arith.constant 3.200000e+01 : f32
    %167 = vector.broadcast %cst_48 : f32 to vector<16x1xf32>
    %168 = arith.divf %166, %167 : vector<16x1xf32>
    %169 = vector.broadcast %161 : vector<16x1xf32> to vector<16x32xf32>
    %170 = arith.subf %157, %169 : vector<16x32xf32>
    %cst_49 = arith.constant 9.99999974E-6 : f32
    %171 = vector.broadcast %cst_49 : f32 to vector<16x1xf32>
    %172 = arith.addf %168, %171 : vector<16x1xf32>
    %173 = math.rsqrt %172 : vector<16x1xf32>
    %174 = vector.broadcast %173 : vector<16x1xf32> to vector<16x32xf32>
    %175 = arith.mulf %170, %174 : vector<16x32xf32>
    %176 = vector.broadcast %26 : vector<1x32xf32> to vector<16x32xf32>
    %177 = arith.mulf %175, %176 : vector<16x32xf32>
    %178 = vector.broadcast %27 : vector<1x32xf32> to vector<16x32xf32>
    %179 = arith.addf %177, %178 : vector<16x32xf32>
    %180 = arith.truncf %179 : vector<16x32xf32> to vector<16x32xbf16>
    %c0_50 = arith.constant 0 : index
    %c0_51 = arith.constant 0 : index
    %c0_52 = arith.constant 0 : index
    %181 = vector.load %arg5[%c0_50, %c0_51, %c0_52] : memref<2x32x128xbf16, #tpu.memory_space<vmem>>, vector<1x32x128xbf16>
    %182 = vector.shape_cast %181 : vector<1x32x128xbf16> to vector<32x128xbf16>
    %cst_53 = arith.constant dense<0.000000e+00> : vector<16x128xf32>
    %183 = tpu.matmul %180, %182, %cst_53 {dimension_numbers = #tpu.dot_dimension_numbers<[1], [0], [0], [1], [0, 0, 1, 1], [], []>} : vector<16x32xbf16>, vector<32x128xbf16>, vector<16x128xf32> -> vector<16x128xf32>
    %184 = vector.broadcast %31 : vector<1x128xf32> to vector<16x128xf32>
    %185 = arith.addf %183, %184 : vector<16x128xf32>
    %cst_54 = arith.constant 0.000000e+00 : f32
    %186 = vector.broadcast %cst_54 : f32 to vector<16x128xf32>
    %187 = arith.maximumf %185, %186 : vector<16x128xf32>
    %188 = arith.truncf %187 : vector<16x128xf32> to vector<16x128xbf16>
    %c0_55 = arith.constant 0 : index
    %c0_56 = arith.constant 0 : index
    %c0_57 = arith.constant 0 : index
    %189 = vector.load %arg6[%c0_55, %c0_56, %c0_57] : memref<2x128x32xbf16, #tpu.memory_space<vmem>>, vector<1x128x32xbf16>
    %190 = vector.shape_cast %189 : vector<1x128x32xbf16> to vector<128x32xbf16>
    %cst_58 = arith.constant dense<0.000000e+00> : vector<16x32xf32>
    %191 = tpu.matmul %188, %190, %cst_58 {dimension_numbers = #tpu.dot_dimension_numbers<[1], [0], [0], [1], [0, 0, 1, 1], [], []>} : vector<16x128xbf16>, vector<128x32xbf16>, vector<16x32xf32> -> vector<16x32xf32>
    %192 = vector.broadcast %29 : vector<1x32xf32> to vector<16x32xf32>
    %193 = arith.addf %191, %192 : vector<16x32xf32>
    %194 = arith.addf %157, %193 : vector<16x32xf32>
    %c1 = arith.constant 1 : index
    %c0_59 = arith.constant 0 : index
    %c0_60 = arith.constant 0 : index
    %195 = vector.load %arg7[%c1, %c0_59, %c0_60] : memref<2x8x32xf32, #tpu.memory_space<vmem>>, vector<1x8x32xf32>
    %196 = vector.shape_cast %195 : vector<1x8x32xf32> to vector<8x32xf32>
    %197 = vector.extract_strided_slice %196 {offsets = [0, 0], sizes = [1, 32], strides = [1, 1]} : vector<8x32xf32> to vector<1x32xf32>
    %198 = vector.extract_strided_slice %196 {offsets = [1, 0], sizes = [1, 32], strides = [1, 1]} : vector<8x32xf32> to vector<1x32xf32>
    %199 = vector.extract_strided_slice %196 {offsets = [2, 0], sizes = [1, 32], strides = [1, 1]} : vector<8x32xf32> to vector<1x32xf32>
    %200 = vector.extract_strided_slice %196 {offsets = [3, 0], sizes = [1, 32], strides = [1, 1]} : vector<8x32xf32> to vector<1x32xf32>
    %201 = vector.extract_strided_slice %196 {offsets = [4, 0], sizes = [1, 32], strides = [1, 1]} : vector<8x32xf32> to vector<1x32xf32>
    %202 = vector.extract_strided_slice %196 {offsets = [5, 0], sizes = [1, 32], strides = [1, 1]} : vector<8x32xf32> to vector<1x32xf32>
    %c1_61 = arith.constant 1 : index
    %c0_62 = arith.constant 0 : index
    %c0_63 = arith.constant 0 : index
    %203 = vector.load %arg8[%c1_61, %c0_62, %c0_63] : memref<2x1x128xf32, #tpu.memory_space<vmem>>, vector<1x1x128xf32>
    %204 = vector.shape_cast %203 : vector<1x1x128xf32> to vector<1x128xf32>
    %cst_64 = arith.constant dense<0.000000e+00> : vector<16xf32>
    %205 = vector.multi_reduction <add>, %194, %cst_64 [1] : vector<16x32xf32> to vector<16xf32>
    %206 = vector.shape_cast %205 : vector<16xf32> to vector<16x1xf32>
    %cst_65 = arith.constant 3.200000e+01 : f32
    %207 = vector.broadcast %cst_65 : f32 to vector<16x1xf32>
    %208 = arith.divf %206, %207 : vector<16x1xf32>
    %209 = vector.broadcast %208 : vector<16x1xf32> to vector<16x32xf32>
    %210 = arith.subf %194, %209 : vector<16x32xf32>
    %211 = arith.mulf %210, %210 : vector<16x32xf32>
    %cst_66 = arith.constant dense<0.000000e+00> : vector<16xf32>
    %212 = vector.multi_reduction <add>, %211, %cst_66 [1] : vector<16x32xf32> to vector<16xf32>
    %213 = vector.shape_cast %212 : vector<16xf32> to vector<16x1xf32>
    %cst_67 = arith.constant 3.200000e+01 : f32
    %214 = vector.broadcast %cst_67 : f32 to vector<16x1xf32>
    %215 = arith.divf %213, %214 : vector<16x1xf32>
    %216 = vector.broadcast %208 : vector<16x1xf32> to vector<16x32xf32>
    %217 = arith.subf %194, %216 : vector<16x32xf32>
    %cst_68 = arith.constant 9.99999974E-6 : f32
    %218 = vector.broadcast %cst_68 : f32 to vector<16x1xf32>
    %219 = arith.addf %215, %218 : vector<16x1xf32>
    %220 = math.rsqrt %219 : vector<16x1xf32>
    %221 = vector.broadcast %220 : vector<16x1xf32> to vector<16x32xf32>
    %222 = arith.mulf %217, %221 : vector<16x32xf32>
    %223 = vector.broadcast %197 : vector<1x32xf32> to vector<16x32xf32>
    %224 = arith.mulf %222, %223 : vector<16x32xf32>
    %225 = vector.broadcast %198 : vector<1x32xf32> to vector<16x32xf32>
    %226 = arith.addf %224, %225 : vector<16x32xf32>
    %227 = arith.truncf %226 : vector<16x32xf32> to vector<16x32xbf16>
    %c1_69 = arith.constant 1 : index
    %c0_70 = arith.constant 0 : index
    %c0_71 = arith.constant 0 : index
    %228 = vector.load %arg3[%c1_69, %c0_70, %c0_71] : memref<2x32x96xbf16, #tpu.memory_space<vmem>>, vector<1x32x96xbf16>
    %229 = vector.shape_cast %228 : vector<1x32x96xbf16> to vector<32x96xbf16>
    %cst_72 = arith.constant dense<0.000000e+00> : vector<16x96xf32>
    %230 = tpu.matmul %227, %229, %cst_72 {dimension_numbers = #tpu.dot_dimension_numbers<[1], [0], [0], [1], [0, 0, 1, 1], [], []>} : vector<16x32xbf16>, vector<32x96xbf16>, vector<16x96xf32> -> vector<16x96xf32>
    %231 = arith.truncf %230 : vector<16x96xf32> to vector<16x96xbf16>
    %232 = vector.extract_strided_slice %231 {offsets = [0, 0], sizes = [16, 32], strides = [1, 1]} : vector<16x96xbf16> to vector<16x32xbf16>
    %233 = vector.shape_cast %232 : vector<16x32xbf16> to vector<2x8x32xbf16>
    %234 = vector.extract_strided_slice %231 {offsets = [0, 32], sizes = [16, 32], strides = [1, 1]} : vector<16x96xbf16> to vector<16x32xbf16>
    %235 = vector.shape_cast %234 : vector<16x32xbf16> to vector<2x8x32xbf16>
    %236 = vector.extract_strided_slice %231 {offsets = [0, 64], sizes = [16, 32], strides = [1, 1]} : vector<16x96xbf16> to vector<16x32xbf16>
    %237 = vector.shape_cast %236 : vector<16x32xbf16> to vector<2x8x32xbf16>
    %238 = vector.extract_strided_slice %233 {offsets = [0, 0, 0], sizes = [2, 8, 8], strides = [1, 1, 1]} : vector<2x8x32xbf16> to vector<2x8x8xbf16>
    %239 = vector.extract_strided_slice %235 {offsets = [0, 0, 0], sizes = [2, 8, 8], strides = [1, 1, 1]} : vector<2x8x32xbf16> to vector<2x8x8xbf16>
    %240 = vector.extract_strided_slice %237 {offsets = [0, 0, 0], sizes = [2, 8, 8], strides = [1, 1, 1]} : vector<2x8x32xbf16> to vector<2x8x8xbf16>
    "tpu.trace_start"() <{level = 10 : i32, message = "btd,bsd->bts"}> : () -> ()
    %cst_73 = arith.constant dense<0.000000e+00> : vector<2x8x8xf32>
    %241 = tpu.matmul %238, %239, %cst_73 {dimension_numbers = #tpu.dot_dimension_numbers<[2], [2], [1], [1], [0, 0, 0, 1, 1, 1], [0], [0]>} : vector<2x8x8xbf16>, vector<2x8x8xbf16>, vector<2x8x8xf32> -> vector<2x8x8xf32>
    "tpu.trace_stop"() : () -> ()
    %242 = vector.broadcast %0 : f32 to vector<2x8x8xf32>
    %243 = arith.mulf %241, %242 : vector<2x8x8xf32>
    %244 = vector.shape_cast %21 : vector<8x8xf32> to vector<1x8x8xf32>
    %245 = vector.broadcast %244 : vector<1x8x8xf32> to vector<2x8x8xf32>
    %246 = arith.addf %243, %245 : vector<2x8x8xf32>
    %cst_74 = arith.constant dense<0xFF800000> : vector<2x8xf32>
    %247 = vector.multi_reduction <maximumf>, %246, %cst_74 [2] : vector<2x8x8xf32> to vector<2x8xf32>
    %248 = vector.shape_cast %247 : vector<2x8xf32> to vector<2x8x1xf32>
    %249 = vector.broadcast %248 : vector<2x8x1xf32> to vector<2x8x8xf32>
    %250 = arith.subf %246, %249 : vector<2x8x8xf32>
    %251 = math.exp %250 : vector<2x8x8xf32>
    %cst_75 = arith.constant dense<0.000000e+00> : vector<2x8xf32>
    %252 = vector.multi_reduction <add>, %251, %cst_75 [2] : vector<2x8x8xf32> to vector<2x8xf32>
    %253 = vector.shape_cast %252 : vector<2x8xf32> to vector<2x8x1xf32>
    %254 = tpu.reciprocal %253 {approx = true} : vector<2x8x1xf32> -> vector<2x8x1xf32>
    %255 = vector.broadcast %254 : vector<2x8x1xf32> to vector<2x8x8xf32>
    %256 = arith.mulf %251, %255 : vector<2x8x8xf32>
    %257 = arith.truncf %256 : vector<2x8x8xf32> to vector<2x8x8xbf16>
    "tpu.trace_start"() <{level = 10 : i32, message = "bts,bsd->btd"}> : () -> ()
    %cst_76 = arith.constant dense<0.000000e+00> : vector<2x8x8xf32>
    %258 = tpu.matmul %257, %240, %cst_76 {dimension_numbers = #tpu.dot_dimension_numbers<[2], [1], [1], [2], [0, 0, 0, 1, 1, 2], [0], [0]>} : vector<2x8x8xbf16>, vector<2x8x8xbf16>, vector<2x8x8xf32> -> vector<2x8x8xf32>
    "tpu.trace_stop"() : () -> ()
    %259 = vector.extract_strided_slice %233 {offsets = [0, 0, 8], sizes = [2, 8, 8], strides = [1, 1, 1]} : vector<2x8x32xbf16> to vector<2x8x8xbf16>
    %260 = vector.extract_strided_slice %235 {offsets = [0, 0, 8], sizes = [2, 8, 8], strides = [1, 1, 1]} : vector<2x8x32xbf16> to vector<2x8x8xbf16>
    %261 = vector.extract_strided_slice %237 {offsets = [0, 0, 8], sizes = [2, 8, 8], strides = [1, 1, 1]} : vector<2x8x32xbf16> to vector<2x8x8xbf16>
    "tpu.trace_start"() <{level = 10 : i32, message = "btd,bsd->bts"}> : () -> ()
    %cst_77 = arith.constant dense<0.000000e+00> : vector<2x8x8xf32>
    %262 = tpu.matmul %259, %260, %cst_77 {dimension_numbers = #tpu.dot_dimension_numbers<[2], [2], [1], [1], [0, 0, 0, 1, 1, 1], [0], [0]>} : vector<2x8x8xbf16>, vector<2x8x8xbf16>, vector<2x8x8xf32> -> vector<2x8x8xf32>
    "tpu.trace_stop"() : () -> ()
    %263 = vector.broadcast %0 : f32 to vector<2x8x8xf32>
    %264 = arith.mulf %262, %263 : vector<2x8x8xf32>
    %265 = vector.shape_cast %21 : vector<8x8xf32> to vector<1x8x8xf32>
    %266 = vector.broadcast %265 : vector<1x8x8xf32> to vector<2x8x8xf32>
    %267 = arith.addf %264, %266 : vector<2x8x8xf32>
    %cst_78 = arith.constant dense<0xFF800000> : vector<2x8xf32>
    %268 = vector.multi_reduction <maximumf>, %267, %cst_78 [2] : vector<2x8x8xf32> to vector<2x8xf32>
    %269 = vector.shape_cast %268 : vector<2x8xf32> to vector<2x8x1xf32>
    %270 = vector.broadcast %269 : vector<2x8x1xf32> to vector<2x8x8xf32>
    %271 = arith.subf %267, %270 : vector<2x8x8xf32>
    %272 = math.exp %271 : vector<2x8x8xf32>
    %cst_79 = arith.constant dense<0.000000e+00> : vector<2x8xf32>
    %273 = vector.multi_reduction <add>, %272, %cst_79 [2] : vector<2x8x8xf32> to vector<2x8xf32>
    %274 = vector.shape_cast %273 : vector<2x8xf32> to vector<2x8x1xf32>
    %275 = tpu.reciprocal %274 {approx = true} : vector<2x8x1xf32> -> vector<2x8x1xf32>
    %276 = vector.broadcast %275 : vector<2x8x1xf32> to vector<2x8x8xf32>
    %277 = arith.mulf %272, %276 : vector<2x8x8xf32>
    %278 = arith.truncf %277 : vector<2x8x8xf32> to vector<2x8x8xbf16>
    "tpu.trace_start"() <{level = 10 : i32, message = "bts,bsd->btd"}> : () -> ()
    %cst_80 = arith.constant dense<0.000000e+00> : vector<2x8x8xf32>
    %279 = tpu.matmul %278, %261, %cst_80 {dimension_numbers = #tpu.dot_dimension_numbers<[2], [1], [1], [2], [0, 0, 0, 1, 1, 2], [0], [0]>} : vector<2x8x8xbf16>, vector<2x8x8xbf16>, vector<2x8x8xf32> -> vector<2x8x8xf32>
    "tpu.trace_stop"() : () -> ()
    %280 = vector.extract_strided_slice %233 {offsets = [0, 0, 16], sizes = [2, 8, 8], strides = [1, 1, 1]} : vector<2x8x32xbf16> to vector<2x8x8xbf16>
    %281 = vector.extract_strided_slice %235 {offsets = [0, 0, 16], sizes = [2, 8, 8], strides = [1, 1, 1]} : vector<2x8x32xbf16> to vector<2x8x8xbf16>
    %282 = vector.extract_strided_slice %237 {offsets = [0, 0, 16], sizes = [2, 8, 8], strides = [1, 1, 1]} : vector<2x8x32xbf16> to vector<2x8x8xbf16>
    "tpu.trace_start"() <{level = 10 : i32, message = "btd,bsd->bts"}> : () -> ()
    %cst_81 = arith.constant dense<0.000000e+00> : vector<2x8x8xf32>
    %283 = tpu.matmul %280, %281, %cst_81 {dimension_numbers = #tpu.dot_dimension_numbers<[2], [2], [1], [1], [0, 0, 0, 1, 1, 1], [0], [0]>} : vector<2x8x8xbf16>, vector<2x8x8xbf16>, vector<2x8x8xf32> -> vector<2x8x8xf32>
    "tpu.trace_stop"() : () -> ()
    %284 = vector.broadcast %0 : f32 to vector<2x8x8xf32>
    %285 = arith.mulf %283, %284 : vector<2x8x8xf32>
    %286 = vector.shape_cast %21 : vector<8x8xf32> to vector<1x8x8xf32>
    %287 = vector.broadcast %286 : vector<1x8x8xf32> to vector<2x8x8xf32>
    %288 = arith.addf %285, %287 : vector<2x8x8xf32>
    %cst_82 = arith.constant dense<0xFF800000> : vector<2x8xf32>
    %289 = vector.multi_reduction <maximumf>, %288, %cst_82 [2] : vector<2x8x8xf32> to vector<2x8xf32>
    %290 = vector.shape_cast %289 : vector<2x8xf32> to vector<2x8x1xf32>
    %291 = vector.broadcast %290 : vector<2x8x1xf32> to vector<2x8x8xf32>
    %292 = arith.subf %288, %291 : vector<2x8x8xf32>
    %293 = math.exp %292 : vector<2x8x8xf32>
    %cst_83 = arith.constant dense<0.000000e+00> : vector<2x8xf32>
    %294 = vector.multi_reduction <add>, %293, %cst_83 [2] : vector<2x8x8xf32> to vector<2x8xf32>
    %295 = vector.shape_cast %294 : vector<2x8xf32> to vector<2x8x1xf32>
    %296 = tpu.reciprocal %295 {approx = true} : vector<2x8x1xf32> -> vector<2x8x1xf32>
    %297 = vector.broadcast %296 : vector<2x8x1xf32> to vector<2x8x8xf32>
    %298 = arith.mulf %293, %297 : vector<2x8x8xf32>
    %299 = arith.truncf %298 : vector<2x8x8xf32> to vector<2x8x8xbf16>
    "tpu.trace_start"() <{level = 10 : i32, message = "bts,bsd->btd"}> : () -> ()
    %cst_84 = arith.constant dense<0.000000e+00> : vector<2x8x8xf32>
    %300 = tpu.matmul %299, %282, %cst_84 {dimension_numbers = #tpu.dot_dimension_numbers<[2], [1], [1], [2], [0, 0, 0, 1, 1, 2], [0], [0]>} : vector<2x8x8xbf16>, vector<2x8x8xbf16>, vector<2x8x8xf32> -> vector<2x8x8xf32>
    "tpu.trace_stop"() : () -> ()
    %301 = vector.extract_strided_slice %233 {offsets = [0, 0, 24], sizes = [2, 8, 8], strides = [1, 1, 1]} : vector<2x8x32xbf16> to vector<2x8x8xbf16>
    %302 = vector.extract_strided_slice %235 {offsets = [0, 0, 24], sizes = [2, 8, 8], strides = [1, 1, 1]} : vector<2x8x32xbf16> to vector<2x8x8xbf16>
    %303 = vector.extract_strided_slice %237 {offsets = [0, 0, 24], sizes = [2, 8, 8], strides = [1, 1, 1]} : vector<2x8x32xbf16> to vector<2x8x8xbf16>
    "tpu.trace_start"() <{level = 10 : i32, message = "btd,bsd->bts"}> : () -> ()
    %cst_85 = arith.constant dense<0.000000e+00> : vector<2x8x8xf32>
    %304 = tpu.matmul %301, %302, %cst_85 {dimension_numbers = #tpu.dot_dimension_numbers<[2], [2], [1], [1], [0, 0, 0, 1, 1, 1], [0], [0]>} : vector<2x8x8xbf16>, vector<2x8x8xbf16>, vector<2x8x8xf32> -> vector<2x8x8xf32>
    "tpu.trace_stop"() : () -> ()
    %305 = vector.broadcast %0 : f32 to vector<2x8x8xf32>
    %306 = arith.mulf %304, %305 : vector<2x8x8xf32>
    %307 = vector.shape_cast %21 : vector<8x8xf32> to vector<1x8x8xf32>
    %308 = vector.broadcast %307 : vector<1x8x8xf32> to vector<2x8x8xf32>
    %309 = arith.addf %306, %308 : vector<2x8x8xf32>
    %cst_86 = arith.constant dense<0xFF800000> : vector<2x8xf32>
    %310 = vector.multi_reduction <maximumf>, %309, %cst_86 [2] : vector<2x8x8xf32> to vector<2x8xf32>
    %311 = vector.shape_cast %310 : vector<2x8xf32> to vector<2x8x1xf32>
    %312 = vector.broadcast %311 : vector<2x8x1xf32> to vector<2x8x8xf32>
    %313 = arith.subf %309, %312 : vector<2x8x8xf32>
    %314 = math.exp %313 : vector<2x8x8xf32>
    %cst_87 = arith.constant dense<0.000000e+00> : vector<2x8xf32>
    %315 = vector.multi_reduction <add>, %314, %cst_87 [2] : vector<2x8x8xf32> to vector<2x8xf32>
    %316 = vector.shape_cast %315 : vector<2x8xf32> to vector<2x8x1xf32>
    %317 = tpu.reciprocal %316 {approx = true} : vector<2x8x1xf32> -> vector<2x8x1xf32>
    %318 = vector.broadcast %317 : vector<2x8x1xf32> to vector<2x8x8xf32>
    %319 = arith.mulf %314, %318 : vector<2x8x8xf32>
    %320 = arith.truncf %319 : vector<2x8x8xf32> to vector<2x8x8xbf16>
    "tpu.trace_start"() <{level = 10 : i32, message = "bts,bsd->btd"}> : () -> ()
    %cst_88 = arith.constant dense<0.000000e+00> : vector<2x8x8xf32>
    %321 = tpu.matmul %320, %303, %cst_88 {dimension_numbers = #tpu.dot_dimension_numbers<[2], [1], [1], [2], [0, 0, 0, 1, 1, 2], [0], [0]>} : vector<2x8x8xbf16>, vector<2x8x8xbf16>, vector<2x8x8xf32> -> vector<2x8x8xf32>
    "tpu.trace_stop"() : () -> ()
    %322 = tpu.concatenate %258, %279, %300, %321 in 2 : vector<2x8x8xf32>, vector<2x8x8xf32>, vector<2x8x8xf32>, vector<2x8x8xf32> -> vector<2x8x32xf32>
    %323 = vector.shape_cast %322 : vector<2x8x32xf32> to vector<16x32xf32>
    %324 = arith.truncf %323 : vector<16x32xf32> to vector<16x32xbf16>
    %c1_89 = arith.constant 1 : index
    %c0_90 = arith.constant 0 : index
    %c0_91 = arith.constant 0 : index
    %325 = vector.load %arg4[%c1_89, %c0_90, %c0_91] : memref<2x32x32xbf16, #tpu.memory_space<vmem>>, vector<1x32x32xbf16>
    %326 = vector.shape_cast %325 : vector<1x32x32xbf16> to vector<32x32xbf16>
    %cst_92 = arith.constant dense<0.000000e+00> : vector<16x32xf32>
    %327 = tpu.matmul %324, %326, %cst_92 {dimension_numbers = #tpu.dot_dimension_numbers<[1], [0], [0], [1], [0, 0, 1, 1], [], []>} : vector<16x32xbf16>, vector<32x32xbf16>, vector<16x32xf32> -> vector<16x32xf32>
    %328 = vector.broadcast %201 : vector<1x32xf32> to vector<16x32xf32>
    %329 = arith.addf %327, %328 : vector<16x32xf32>
    %330 = arith.addf %194, %329 : vector<16x32xf32>
    %cst_93 = arith.constant dense<0.000000e+00> : vector<16xf32>
    %331 = vector.multi_reduction <add>, %330, %cst_93 [1] : vector<16x32xf32> to vector<16xf32>
    %332 = vector.shape_cast %331 : vector<16xf32> to vector<16x1xf32>
    %cst_94 = arith.constant 3.200000e+01 : f32
    %333 = vector.broadcast %cst_94 : f32 to vector<16x1xf32>
    %334 = arith.divf %332, %333 : vector<16x1xf32>
    %335 = vector.broadcast %334 : vector<16x1xf32> to vector<16x32xf32>
    %336 = arith.subf %330, %335 : vector<16x32xf32>
    %337 = arith.mulf %336, %336 : vector<16x32xf32>
    %cst_95 = arith.constant dense<0.000000e+00> : vector<16xf32>
    %338 = vector.multi_reduction <add>, %337, %cst_95 [1] : vector<16x32xf32> to vector<16xf32>
    %339 = vector.shape_cast %338 : vector<16xf32> to vector<16x1xf32>
    %cst_96 = arith.constant 3.200000e+01 : f32
    %340 = vector.broadcast %cst_96 : f32 to vector<16x1xf32>
    %341 = arith.divf %339, %340 : vector<16x1xf32>
    %342 = vector.broadcast %334 : vector<16x1xf32> to vector<16x32xf32>
    %343 = arith.subf %330, %342 : vector<16x32xf32>
    %cst_97 = arith.constant 9.99999974E-6 : f32
    %344 = vector.broadcast %cst_97 : f32 to vector<16x1xf32>
    %345 = arith.addf %341, %344 : vector<16x1xf32>
    %346 = math.rsqrt %345 : vector<16x1xf32>
    %347 = vector.broadcast %346 : vector<16x1xf32> to vector<16x32xf32>
    %348 = arith.mulf %343, %347 : vector<16x32xf32>
    %349 = vector.broadcast %199 : vector<1x32xf32> to vector<16x32xf32>
    %350 = arith.mulf %348, %349 : vector<16x32xf32>
    %351 = vector.broadcast %200 : vector<1x32xf32> to vector<16x32xf32>
    %352 = arith.addf %350, %351 : vector<16x32xf32>
    %353 = arith.truncf %352 : vector<16x32xf32> to vector<16x32xbf16>
    %c1_98 = arith.constant 1 : index
    %c0_99 = arith.constant 0 : index
    %c0_100 = arith.constant 0 : index
    %354 = vector.load %arg5[%c1_98, %c0_99, %c0_100] : memref<2x32x128xbf16, #tpu.memory_space<vmem>>, vector<1x32x128xbf16>
    %355 = vector.shape_cast %354 : vector<1x32x128xbf16> to vector<32x128xbf16>
    %cst_101 = arith.constant dense<0.000000e+00> : vector<16x128xf32>
    %356 = tpu.matmul %353, %355, %cst_101 {dimension_numbers = #tpu.dot_dimension_numbers<[1], [0], [0], [1], [0, 0, 1, 1], [], []>} : vector<16x32xbf16>, vector<32x128xbf16>, vector<16x128xf32> -> vector<16x128xf32>
    %357 = vector.broadcast %204 : vector<1x128xf32> to vector<16x128xf32>
    %358 = arith.addf %356, %357 : vector<16x128xf32>
    %cst_102 = arith.constant 0.000000e+00 : f32
    %359 = vector.broadcast %cst_102 : f32 to vector<16x128xf32>
    %360 = arith.maximumf %358, %359 : vector<16x128xf32>
    %361 = arith.truncf %360 : vector<16x128xf32> to vector<16x128xbf16>
    %c1_103 = arith.constant 1 : index
    %c0_104 = arith.constant 0 : index
    %c0_105 = arith.constant 0 : index
    %362 = vector.load %arg6[%c1_103, %c0_104, %c0_105] : memref<2x128x32xbf16, #tpu.memory_space<vmem>>, vector<1x128x32xbf16>
    %363 = vector.shape_cast %362 : vector<1x128x32xbf16> to vector<128x32xbf16>
    %cst_106 = arith.constant dense<0.000000e+00> : vector<16x32xf32>
    %364 = tpu.matmul %361, %363, %cst_106 {dimension_numbers = #tpu.dot_dimension_numbers<[1], [0], [0], [1], [0, 0, 1, 1], [], []>} : vector<16x128xbf16>, vector<128x32xbf16>, vector<16x32xf32> -> vector<16x32xf32>
    %365 = vector.broadcast %202 : vector<1x32xf32> to vector<16x32xf32>
    %366 = arith.addf %364, %365 : vector<16x32xf32>
    %367 = arith.addf %330, %366 : vector<16x32xf32>
    %cst_107 = arith.constant dense<0.000000e+00> : vector<16xf32>
    %368 = vector.multi_reduction <add>, %367, %cst_107 [1] : vector<16x32xf32> to vector<16xf32>
    %369 = vector.shape_cast %368 : vector<16xf32> to vector<16x1xf32>
    %cst_108 = arith.constant 3.200000e+01 : f32
    %370 = vector.broadcast %cst_108 : f32 to vector<16x1xf32>
    %371 = arith.divf %369, %370 : vector<16x1xf32>
    %372 = vector.broadcast %371 : vector<16x1xf32> to vector<16x32xf32>
    %373 = arith.subf %367, %372 : vector<16x32xf32>
    %374 = arith.mulf %373, %373 : vector<16x32xf32>
    %cst_109 = arith.constant dense<0.000000e+00> : vector<16xf32>
    %375 = vector.multi_reduction <add>, %374, %cst_109 [1] : vector<16x32xf32> to vector<16xf32>
    %376 = vector.shape_cast %375 : vector<16xf32> to vector<16x1xf32>
    %cst_110 = arith.constant 3.200000e+01 : f32
    %377 = vector.broadcast %cst_110 : f32 to vector<16x1xf32>
    %378 = arith.divf %376, %377 : vector<16x1xf32>
    %379 = vector.broadcast %371 : vector<16x1xf32> to vector<16x32xf32>
    %380 = arith.subf %367, %379 : vector<16x32xf32>
    %cst_111 = arith.constant 9.99999974E-6 : f32
    %381 = vector.broadcast %cst_111 : f32 to vector<16x1xf32>
    %382 = arith.addf %378, %381 : vector<16x1xf32>
    %383 = math.rsqrt %382 : vector<16x1xf32>
    %384 = vector.broadcast %383 : vector<16x1xf32> to vector<16x32xf32>
    %385 = arith.mulf %380, %384 : vector<16x32xf32>
    %386 = arith.truncf %385 : vector<16x32xf32> to vector<16x32xbf16>
    %c0_112 = arith.constant 0 : index
    %c0_113 = arith.constant 0 : index
    %387 = vector.load %arg9[%c0_112, %c0_113] : memref<32x128xbf16, #tpu.memory_space<vmem>>, vector<32x128xbf16>
    %cst_114 = arith.constant dense<0.000000e+00> : vector<16x128xf32>
    %388 = tpu.matmul %386, %387, %cst_114 {dimension_numbers = #tpu.dot_dimension_numbers<[1], [0], [0], [1], [0, 0, 1, 1], [], []>} : vector<16x32xbf16>, vector<32x128xbf16>, vector<16x128xf32> -> vector<16x128xf32>
    %c0_115 = arith.constant 0 : index
    %c0_116 = arith.constant 0 : index
    %389 = vector.load %arg10[%c0_115, %c0_116] : memref<1x128xf32, #tpu.memory_space<vmem>>, vector<1x128xf32>
    %390 = vector.broadcast %389 : vector<1x128xf32> to vector<16x128xf32>
    %391 = arith.addf %388, %390 : vector<16x128xf32>
    %c0_117 = arith.constant 0 : index
    %c0_118 = arith.constant 0 : index
    %392 = vector.load %arg11[%c0_117, %c0_118] : memref<16x128xf32, #tpu.memory_space<vmem>>, vector<16x128xf32>
    tpu.vector_store %arg11[%c0_117, %c0_118], %391 {strides = array<i32>} : memref<16x128xf32, #tpu.memory_space<vmem>>, vector<16x128xf32>,
    return
  }
}

</mosaic_0001>

<bundles_post_ra>
// kernel: model_forward.1
= control target key start
LH: loop header
LB: loop body
LE: loop exit
PB: predicated region body
PF: predicated region fallthrough
CT: control target
= control target key end

     0   :  { %v3688_v2 = vmov 0   ;;  %s4471_s0 = inlined_call_operand.vmem [shape: s32[2,8,1], index: 0, kind: input, shape index: {}]   ;;  %s4472_s1 = inlined_call_operand.vmem [shape: f32[128,32], index: 1, kind: input, shape index: {}]   ;;  %s4473_s2 = inlined_call_operand.vmem [shape: f32[16,32], index: 2, kind: input, shape index: {}]   ;;  %s4474_s3 = inlined_call_operand.vmem [shape: bf16[2,32,96], index: 3, kind: input, shape index: {}]   ;;  %s4475_s4 = inlined_call_operand.vmem [shape: bf16[2,32,32], index: 4, kind: input, shape index: {}]   ;;  %s4476_s5 = inlined_call_operand.vmem [shape: bf16[2,32,128], index: 5, kind: input, shape index: {}]   ;;  %s4477_s6 = inlined_call_operand.vmem [shape: bf16[2,128,32], index: 6, kind: input, shape index: {}]   ;;  %s4478_s7 = inlined_call_operand.vmem [shape: f32[2,8,32], index: 7, kind: input, shape index: {}]   ;;  %s4479_s8 = inlined_call_operand.vmem [shape: f32[2,1,128], index: 8, kind: input, shape index: {}]   ;;  %s4480_s9 = inlined_call_operand.vmem [shape: bf16[32,128], index: 9, kind: input, shape index: {}]   ;;  %s4481_s10 = inlined_call_operand.vmem [shape: f32[1,128], index: 10, kind: input, shape index: {}]   ;;  %s4482_s11 = inlined_call_operand.hbm [shape: f32[16,128], index: 11, kind: output, shape index: {}]  }
   0x1   :  { %v40_v0 = vld [vmem:[%s4471_s0] sm:$0xff]  ;;  %3519 = vset.pattern.permute.xlu0 %v3688_v2  ;;  %v57_v3 = vld [vmem:[%s4472_s1 + $0x8] sm:$0xff]  ;;  %v58_v4 = vld [vmem:[%s4472_s1 + $0x10] sm:$0xff] }
   0x2   :  { %v56_v1 = vld [vmem:[%s4472_s1] sm:$0xff]  ;;  %v59_v5 = vld [vmem:[%s4472_s1 + $0x18] sm:$0xff]  ;;  %45 = vperm.xlu0 %3519, %v40_v0   ;;  %v41_v8 = vld [vmem:[%s4471_s0 + $0x8] sm:$0xff] }
   0x3   :  { %v3466_v6 = vpack.c.bf16 %v57_v3, %v56_v1  ;;  %v3470_v7 = vpack.c.bf16 %v59_v5, %v58_v4  ;;  %v60_v9 = vld [vmem:[%s4472_s1 + $0x20] sm:$0xff]  ;;  %v61_v10 = vld [vmem:[%s4472_s1 + $0x28] sm:$0xff]  ;;  %v62_v11 = vld [vmem:[%s4472_s1 + $0x30] sm:$0xff] }
   0x4   :  { %v3474_v12 = vpack.c.bf16 %v61_v10, %v60_v9  ;;  %v63_v13 = vld [vmem:[%s4472_s1 + $0x38] sm:$0xff]  ;;  %v64_v14 = vld [vmem:[%s4472_s1 + $0x40] sm:$0xff]  ;;  %v65_v15 = vld [vmem:[%s4472_s1 + $0x48] sm:$0xff] }
   0x5   :  { %3467 = vmatprep.subr.bf16.mxu0 %v3466_v6  ;;  %v3478_v16 = vpack.c.bf16 %v63_v13, %v62_v11  ;;  %v66_v17 = vld [vmem:[%s4472_s1 + $0x50] sm:$0xff]  ;;  %v67_v18 = vld [vmem:[%s4472_s1 + $0x58] sm:$0xff]  ;;  %v3482_v19 = vpack.c.bf16 %v65_v15, %v64_v14  ;;  %v68_v20 = vld [vmem:[%s4472_s1 + $0x60] sm:$0xff] }
   0x6   :  { %3469 = vmatpush3.bf16.msra.mxu0 %v3466_v6  ;;  %48 = vperm.xlu0 %3519, %v41_v8   ;;  %v69_v21 = vld [vmem:[%s4472_s1 + $0x68] sm:$0xff]  ;;  %v3486_v22 = vpack.c.bf16 %v67_v18, %v66_v17  ;;  %v70_v23 = vld [vmem:[%s4472_s1 + $0x70] sm:$0xff]  ;;  %v71_v24 = vld [vmem:[%s4472_s1 + $0x78] sm:$0xff] }
   0x7   :  { %3471 = vmatprep.subr.bf16.mxu0 %v3470_v7  ;;  %v3490_v25 = vpack.c.bf16 %v69_v21, %v68_v20  ;;  %v3494_v26 = vpack.c.bf16 %v71_v24, %v70_v23 }
   0xa   :  { %3473 = vmatpush3.bf16.msra.mxu0 %v3470_v7 }
   0xb   :  { %3475 = vmatprep.subr.bf16.mxu0 %v3474_v12 }
   0xe   :  { %3477 = vmatpush3.bf16.msra.mxu0 %v3474_v12 }
   0xf   :  { %3479 = vmatprep.subr.bf16.mxu0 %v3478_v16 }
  0x12   :  { %3481 = vmatpush3.bf16.msra.mxu0 %v3478_v16 }
  0x13   :  { %3483 = vmatprep.subr.bf16.mxu0 %v3482_v19 }
  0x16   :  { %3485 = vmatpush3.bf16.msra.mxu0 %v3482_v19 }
  0x17   :  { %3487 = vmatprep.subr.bf16.mxu0 %v3486_v22 }
  0x1a   :  { %3489 = vmatpush3.bf16.msra.mxu0 %v3486_v22 }
  0x1b   :  { %3491 = vmatprep.subr.bf16.mxu0 %v3490_v25 }
  0x1c   :  { %16 = vsyncpa [#allocation3], 0  ;;  %v42_v27 = vlaneseq  ;;  %v3689_v30 = vmov 1.0   ;;  %v147_v32 = vld [vmem:[%s4473_s2] sm:$0xff]  ;;  %vm156_vm2 = vcmask 261120   ;;  %v3690_v50 = vmov 0.0  }
  0x1d   :  { %v3550_v49 = vld [vmem:[%s4474_s3] sm:$0xff]   ;;  %3178 = vmatprep.subr.bf16.mxu1 %v3690_v50  ;;  %v3551_v51 = vld [vmem:[%s4474_s3 + $0x8] sm:$0xff]   ;;  %vm3691_vm3 = vmmov 0   ;;  %s3692_s19 = smov 96   ;;  %vm265_vm4 = vcmask 64512   ;;  %s3694_s20 = smov 88  }
  0x1e   :  { %3493 = vmatpush3.bf16.msra.mxu0 %v3490_v25  ;;  %v3823_v28 = vand.u32 127, %v42_v27  ;;  %3179 = vmatpush3.bf16.msra.mxu1 %v3550_v49  ;;  %v3856_v58 = vshrl.u32 %v42_v27, 7  ;;  %v3862_v60 = vld [vmem:[%s4478_s7] sm:$0xff]  ;;  %v3693_v19 = vmov -1e+30   ;;  %s3695_s21 = smov 64  }
  0x1f   :  { %3495 = vmatprep.subr.bf16.mxu0 %v3494_v26  ;;  %3182 = vmatprep.mubr.msk.bf16.mxu1 %vm3691_vm3, %v3690_v50  ;;  %s3696_s22 = smov 120   ;;  %vm393_vm6 = vcmask 1043456   ;;  %s3697_s23 = smov 56   ;;  %vm1183_vm7 = vcmask 130048   ;;  %vm1186_vm8 = vcmask 195584  }
  0x20   :  { %3180 = vmatprep.subr.bf16.mxu1 %v3690_v50  ;;  %v186_v59 = vsub.s32 0, %v3856_v58  ;;  %v192_v0 = vsub.s32 1, %v3856_v58  ;;  %vm152_vm5 = vcmp.le.s32.totalorder %v3823_v28, %v3856_v58  ;;  %s3698_s24 = smov 80   ;;  %s3699_s25 = smov 112  }
  0x21   :  { %v3896_v20 = vsel %vm152_vm5, 0.0, %v3693_v19  ;;  %s3700_s26 = smov 48   ;;  %s3701_s27 = smov 72  }
  0x22   :  { %3497 = vmatpush3.bf16.msra.mxu0 %v3494_v26  ;;  %3181 = vmatpush3.bf16.msra.mxu1 %v3551_v51  ;;  %v187_v63 = vrot.slane %v3862_v60, %v186_v59  ;;  %v193_v4 = vrot.slane %v3862_v60, %v192_v0  ;;  %s3702_s28 = smov 104   ;;  %s3703_s29 = smov 40  }
  0x23   :  { %3204 = vmatprep.subr.bf16.mxu0 %v3690_v50  ;;  %3186 = vmatprep.subr.bf16.mxu1 %v3690_v50  ;;  %s3704_s30 = smov 16   ;;  %s3705_s12 = smov 8  }
  0x24   :  { %s3706_s15 = smov 24  }
  0x81   :  { %v46_v29 = vpop.permute.xlu0 %45 }
  0x82   :  { %vm50_vm0 = vcmp.eq.s32.totalorder %v3823_v28, %v46_v29 }
  0x83   :  { %3175 = vmatprep.mubr.msk.f32.mxu0 %vm50_vm0, %v3689_v30 }
  0x85   :  { %v49_v31 = vpop.permute.xlu0 %48 }
  0x86   :  { %vm51_vm1 = vcmp.eq.s32.totalorder %v3823_v28, %v49_v31 }
  0x87   :  { %3176 = vmatmul.mubr.msk.f32.vlgmr.msra.gmra.mrb[0].mxu0 %vm51_vm1, %v3689_v30 }
  0x88   :  { %3206 = vmatprep.mubr.msk.bf16.mxu0 %vm3691_vm3, %v3690_v50 }
 0x15a   :  { %v3177_v33 = vpop.f32.mrb[0].mxu0 }
 0x15b   :  { %v138_v34 = vpop.f32.mrb[1].mxu0  ;;  %v3832_v36 = vadd.f32 %v3177_v33, %v147_v32 }
 0x15c   :  { %v3830_v35 = vadd.f32 %v147_v32, %v138_v34 }
 0x15d   :  { %v160_v38 = vsel %vm156_vm2, %v3832_v36, 0.0 }
 0x15e   :  { %v157_v37 = vsel %vm156_vm2, %v3830_v35, 0.0 }
 0x15f   :  { %158 = vadd.xlane.f32.xlu1 %v157_v37 }
 0x163   :  { %161 = vadd.xlane.f32.xlu1 %v160_v38 }
 0x1ec   :  { %v159_v39 = vpop.xlane.xlu1 %158 }
 0x1ed   :  { %v164_v40 = vmul.f32 0.03125, %v159_v39 }
 0x1ef   :  { %v166_v41 = vsub.f32 %v3830_v35, %v164_v40 }
 0x1f0   :  { %v162_v42 = vpop.xlane.xlu1 %161 }
 0x1f1   :  { %v165_v43 = vmul.f32 0.03125, %v162_v42  ;;  %v168_v44 = vmul.f32 %v166_v41, %v166_v41 }
 0x1f3   :  { %v167_v45 = vsub.f32 %v3832_v36, %v165_v43  ;;  %v170_v46 = vsel %vm156_vm2, %v168_v44, 0.0 }
 0x1f4   :  { %171 = vadd.xlane.f32.xlu0 %v170_v46 }
 0x1f5   :  { %v169_v47 = vmul.f32 %v167_v45, %v167_v45 }
 0x1f7   :  { %v173_v48 = vsel %vm156_vm2, %v169_v47, 0.0 }
 0x1f8   :  { %174 = vadd.xlane.f32.xlu1 %v173_v48 }
 0x281   :  { %v172_v52 = vpop.xlane.xlu0 %171 }
 0x282   :  { %v176_v53 = vmul.f32 0.03125, %v172_v52 }
 0x284   :  { %v178_v54 = vadd.f32 1e-05, %v176_v53 }
 0x285   :  { %v175_v55 = vpop.xlane.xlu1 %174 }
 0x286   :  { %3580 = vrsqrt.f32 %v178_v54  ;;  %v177_v56 = vmul.f32 0.03125, %v175_v55 }
 0x288   :  { %v179_v57 = vadd.f32 1e-05, %v177_v56 }
 0x28a   :  { %3582 = vrsqrt.f32 %v179_v57 }
 0x290   :  { %v3581_v61 = vpop.eup %3580 }
 0x291   :  { %v182_v62 = vmul.f32 %v3581_v61, %v166_v41 }
 0x293   :  { %v188_v3 = vmul.f32 %v187_v63, %v182_v62 }
 0x294   :  { %v3583_v1 = vpop.eup %3582 }
 0x295   :  { %v183_v2 = vmul.f32 %v3583_v1, %v167_v45  ;;  %v194_v6 = vadd.f32 %v193_v4, %v188_v3 }
 0x297   :  { %v189_v5 = vmul.f32 %v187_v63, %v183_v2 }
 0x299   :  { %v195_v7 = vadd.f32 %v193_v4, %v189_v5 }
 0x29b   :  { %v196_v8 = vpack.c.bf16 %v195_v7, %v194_v6 }
 0x29d   :  { %3183 = vmatmul.mubr.msk.bf16.vlgmr.msra.gmra.mrb[0].mxu1 %vm156_vm2, %v196_v8 }
 0x29e   :  { %3188 = vmatprep.mubr.msk.bf16.mxu1 %vm3691_vm3, %v3690_v50 }
 0x370   :  { %v250_v9 = vpop.f32.mrb[0].mxu1 }
 0x371   :  { %v3874_v10 = vpack.c.bf16 %v250_v9, %v250_v9  ;;  %v3184_v11 = vpop.f32.mrb[1].mxu1 }
 0x372   :  { %v253_v12 = vpop.f32.mrb[2].mxu1 }
 0x373   :  { %v3876_v13 = vpack.c.bf16 %v253_v12, %v253_v12  ;;  %263 = vrot.lane.b32.xlu1 %v3874_v10, %s3692_s19  ;;  %v3185_v14 = vpop.f32.mrb[3].mxu1 }
 0x375   :  { %312 = vrot.lane.b32.xlu0 %v3876_v13, %s3692_s19 }
 0x3e5   :  { %v264_v15 = vpop.permute.xlu1 %263 }
 0x3e6   :  { %v270_v16 = vsel %vm265_vm4, %v264_v15, 0 }
 0x3e7   :  { %3187 = vmatpush3.bf16.xpose.msra.mxu1 %v270_v16  ;;  %v313_v17 = vpop.permute.xlu0 %312 }
 0x3e8   :  { %3192 = vmatprep.subr.bf16.mxu1 %v3690_v50  ;;  %v318_v18 = vsel %vm265_vm4, %v313_v17, 0 }
 0x3ee   :  { %3189 = vmatmul.mubr.msk.bf16.vlgmr.msra.gmra.mrb[4].mxu1 %vm265_vm4, %v3874_v10 }
 0x3ef   :  { %3193 = vmatpush3.bf16.xpose.msra.mxu1 %v318_v18  ;;  %3194 = vmatprep.mubr.msk.bf16.mxu1 %vm3691_vm3, %v3690_v50 }
 0x3f0   :  { %3198 = vmatprep.subr.bf16.mxu1 %v3690_v50 }
 0x3f6   :  { %3195 = vmatmul.mubr.msk.bf16.vlgmr.msra.gmra.mrb[8].mxu1 %vm265_vm4, %v3876_v13 }
 0x3f7   :  { %3200 = vmatprep.mubr.msk.bf16.mxu1 %vm3691_vm3, %v3690_v50 }
 0x4c1   :  { %v306_v21 = vpop.f32.mrb[4].mxu1 }
 0x4c2   :  { %v360_v22 = vmul.f32 0.17677669, %v306_v21  ;;  %v3190_v23 = vpop.f32.mrb[5].mxu1 }
 0x4c3   :  { %v309_v24 = vpop.f32.mrb[6].mxu1 }
 0x4c4   :  { %v3191_v25 = vpop.f32.mrb[7].mxu1  ;;  %v362_v26 = vadd.f32 %v360_v22, %v3896_v20 }
 0x4c6   :  { %v364_v27 = vsel %vm265_vm4, %v362_v26, -inf }
 0x4c7   :  { %365 = vmax.xlane.f32.xlu1 %v364_v27 }
 0x4c9   :  { %v354_v29 = vpop.f32.mrb[8].mxu1 }
 0x4ca   :  { %v3196_v30 = vpop.f32.mrb[9].mxu1  ;;  %v361_v39 = vmul.f32 0.17677669, %v354_v29 }
 0x4cb   :  { %v357_v31 = vpop.f32.mrb[10].mxu1 }
 0x4cc   :  { %v3197_v32 = vpop.f32.mrb[11].mxu1  ;;  %v363_v40 = vadd.f32 %v361_v39, %v3896_v20 }
 0x4ce   :  { %v367_v41 = vsel %vm265_vm4, %v363_v40, -inf }
 0x4d8   :  { %487 = vrot.lane.b32.xlu1 %v3874_v10, %s3694_s20 }
 0x554   :  { %v366_v28 = vpop.xlane.xlu1 %365 }
 0x555   :  { %v370_v33 = vsub.f32 %v362_v26, %v366_v28 }
 0x557   :  { %v372_v34 = vmul.f32 1.442695, %v370_v33 }
 0x558   :  { %v488_v47 = vpop.permute.xlu1 %487 }
 0x559   :  { %3584 = vpow2.f32 %v372_v34  ;;  %v493_v51 = vsel %vm265_vm4, %v488_v47, 0 }
 0x563   :  { %v3585_v37 = vpop.eup %3584 }
 0x564   :  { %v376_v38 = vsel %vm265_vm4, %v3585_v37, 0.0 }
 0x565   :  { %377 = vadd.xlane.f32.xlu0 %v376_v38 }
 0x57b   :  { %388 = vrot.lane.b32.xlu0 %v3874_v10, %s3695_s21 }
 0x57f   :  { %485 = vrot.lane.b32.xlu0 %v3874_v10, %s3696_s22 }
 0x583   :  { %537 = vrot.lane.b32.xlu0 %v3876_v13, %s3694_s20 }
 0x587   :  { %535 = vrot.lane.b32.xlu0 %v3876_v13, %s3696_s22 }
 0x5a6   :  { %368 = vmax.xlane.f32.xlu0 %v367_v41 }
 0x5f2   :  { %v378_v42 = vpop.xlane.xlu0 %377 }
 0x5f3   :  { %3586 = vrcp.f32 %v378_v42 }
 0x5f6   :  { %v389_v43 = vpop.permute.xlu0 %388 }
 0x5f7   :  { %v395_v44 = vsel %vm393_vm6, %v389_v43, 0 }
 0x5f8   :  { %3199 = vmatpush3.bf16.msra.mxu1 %v395_v44 }
 0x5f9   :  { %3210 = vmatprep.subr.bf16.mxu1 %v3690_v50 }
 0x5fa   :  { %v486_v49 = vpop.permute.xlu0 %485 }
 0x5fd   :  { %v3587_v45 = vpop.eup %3586 }
 0x5fe   :  { %v384_v46 = vmul.f32 %v3587_v45, %v3585_v37  ;;  %v538_v52 = vpop.permute.xlu0 %537 }
 0x5ff   :  { %v543_v53 = vsel %vm265_vm4, %v538_v52, 0 }
 0x600   :  { %v386_v48 = vpack.c.bf16 %v384_v46, %v384_v46 }
 0x602   :  { %3201 = vmatmul.mubr.msk.bf16.vlgmr.msra.gmra.mrb[12].mxu1 %vm265_vm4, %v386_v48  ;;  %v536_v54 = vpop.permute.xlu0 %535 }
 0x603   :  { %3211 = vmatpush3.bf16.xpose.msra.mxu1 %v493_v51  ;;  %3212 = vmatprep.mubr.msk.bf16.mxu1 %vm3691_vm3, %v3690_v50 }
 0x604   :  { %3216 = vmatprep.subr.bf16.mxu1 %v3690_v50 }
 0x60a   :  { %3213 = vmatmul.mubr.msk.bf16.vlgmr.msra.gmra.mrb[16].mxu1 %vm265_vm4, %v486_v49 }
 0x60b   :  { %3217 = vmatpush3.bf16.xpose.msra.mxu1 %v543_v53  ;;  %3218 = vmatprep.mubr.msk.bf16.mxu1 %vm3691_vm3, %v3690_v50 }
 0x60c   :  { %3222 = vmatprep.subr.bf16.mxu1 %v3690_v50 }
 0x612   :  { %3219 = vmatmul.mubr.msk.bf16.vlgmr.msra.gmra.mrb[20].mxu1 %vm265_vm4, %v536_v54 }
 0x613   :  { %3224 = vmatprep.mubr.msk.bf16.mxu1 %vm3691_vm3, %v3690_v50 }
 0x633   :  { %v369_v56 = vpop.xlane.xlu0 %368 }
 0x634   :  { %v371_v63 = vsub.f32 %v363_v40, %v369_v56 }
 0x636   :  { %v374_v1 = vmul.f32 1.442695, %v371_v63 }
 0x638   :  { %3588 = vpow2.f32 %v374_v1 }
 0x642   :  { %v3589_v18 = vpop.eup %3588 }
 0x643   :  { %v379_v19 = vsel %vm265_vm4, %v3589_v18, 0.0 }
 0x6d5   :  { %v3928_v55 = vpop.f32.mrb[12].mxu1 }
 0x6d6   :  { %v3202_v57 = vpop.f32.mrb[13].mxu1 }
 0x6d7   :  { %v434_v61 = vpop.f32.mrb[14].mxu1 }
 0x6d8   :  { %v3203_v62 = vpop.f32.mrb[15].mxu1 }
 0x6dd   :  { %v529_v2 = vpop.f32.mrb[16].mxu1 }
 0x6de   :  { %v585_v3 = vmul.f32 0.17677669, %v529_v2  ;;  %v3214_v4 = vpop.f32.mrb[17].mxu1 }
 0x6df   :  { %v532_v5 = vpop.f32.mrb[18].mxu1 }
 0x6e0   :  { %v3215_v6 = vpop.f32.mrb[19].mxu1  ;;  %v587_v7 = vadd.f32 %v585_v3, %v3896_v20 }
 0x6e2   :  { %v589_v8 = vsel %vm265_vm4, %v587_v7, -inf }
 0x6e3   :  { %590 = vmax.xlane.f32.xlu1 %v589_v8 }
 0x6e5   :  { %v579_v9 = vpop.f32.mrb[20].mxu1 }
 0x6e6   :  { %v586_v11 = vmul.f32 0.17677669, %v579_v9  ;;  %v3220_v12 = vpop.f32.mrb[21].mxu1 }
 0x6e7   :  { %v582_v14 = vpop.f32.mrb[22].mxu1 }
 0x6e8   :  { %v3221_v15 = vpop.f32.mrb[23].mxu1  ;;  %v588_v16 = vadd.f32 %v586_v11, %v3896_v20 }
 0x6ea   :  { %v592_v17 = vsel %vm265_vm4, %v588_v16, -inf }
 0x6eb   :  { %593 = vmax.xlane.f32.xlu0 %v592_v17 }
 0x6ef   :  { %380 = vadd.xlane.f32.xlu0 %v379_v19 }
 0x6f4   :  { %437 = vrot.lane.b32.xlu1 %v3876_v13, %s3695_s21 }
 0x6f8   :  { %661 = vrot.lane.b32.xlu1 %v3876_v13, %s3697_s23 }
 0x705   :  { %613 = vrot.lane.b32.xlu0 %v3874_v10, %s3697_s23 }
 0x770   :  { %v591_v21 = vpop.xlane.xlu1 %590 }
 0x771   :  { %v595_v22 = vsub.f32 %v587_v7, %v591_v21 }
 0x773   :  { %v597_v23 = vmul.f32 1.442695, %v595_v22 }
 0x774   :  { %v438_v24 = vpop.permute.xlu1 %437 }
 0x775   :  { %3590 = vpow2.f32 %v597_v23  ;;  %v443_v25 = vsel %vm393_vm6, %v438_v24, 0 }
 0x776   :  { %3205 = vmatpush3.bf16.msra.mxu0 %v443_v25 }
 0x777   :  { %3228 = vmatprep.subr.bf16.mxu0 %v3690_v50 }
 0x778   :  { %v594_v26 = vpop.xlane.xlu0 %593  ;;  %v662_v40 = vpop.permute.xlu1 %661 }
 0x779   :  { %v596_v27 = vsub.f32 %v588_v16, %v594_v26  ;;  %v667_v42 = vsel %vm393_vm6, %v662_v40, 0 }
 0x77b   :  { %v599_v29 = vmul.f32 1.442695, %v596_v27 }
 0x77c   :  { %v381_v30 = vpop.xlane.xlu0 %380 }
 0x77d   :  { %3592 = vpow2.f32 %v599_v29 }
 0x77e   :  { %3594 = vrcp.f32 %v381_v30 }
 0x77f   :  { %v3591_v31 = vpop.eup %3590 }
 0x780   :  { %v614_v32 = vpop.permute.xlu0 %613  ;;  %v601_v28 = vsel %vm265_vm4, %v3591_v31, 0.0 }
 0x781   :  { %v619_v33 = vsel %vm393_vm6, %v614_v32, 0  ;;  %602 = vadd.xlane.f32.xlu1 %v601_v28 }
 0x782   :  { %3223 = vmatpush3.bf16.msra.mxu1 %v619_v33 }
 0x783   :  { %3234 = vmatprep.subr.bf16.mxu1 %v3690_v50 }
 0x787   :  { %v3593_v34 = vpop.eup %3592 }
 0x788   :  { %v3595_v37 = vpop.eup %3594  ;;  %v604_v38 = vsel %vm265_vm4, %v3593_v34, 0.0 }
 0x789   :  { %v385_v39 = vmul.f32 %v3595_v37, %v3589_v18  ;;  %605 = vadd.xlane.f32.xlu0 %v604_v38 }
 0x78b   :  { %v387_v41 = vpack.c.bf16 %v385_v39, %v385_v39 }
 0x78d   :  { %3207 = vmatmul.mubr.msk.bf16.vlgmr.msra.gmra.mrb[4].mxu0 %vm265_vm4, %v387_v41 }
 0x78e   :  { %3229 = vmatpush3.bf16.msra.mxu0 %v667_v42  ;;  %3230 = vmatprep.mubr.msk.bf16.mxu0 %vm3691_vm3, %v3690_v50 }
 0x78f   :  { %3240 = vmatprep.subr.bf16.mxu0 %v3690_v50 }
 0x792   :  { %711 = vrot.lane.b32.xlu1 %v3874_v10, %s3698_s24 }
 0x796   :  { %709 = vrot.lane.b32.xlu1 %v3874_v10, %s3699_s25 }
 0x79f   :  { %761 = vrot.lane.b32.xlu0 %v3876_v13, %s3698_s24 }
 0x7a3   :  { %759 = vrot.lane.b32.xlu0 %v3876_v13, %s3699_s25 }
 0x80e   :  { %v603_v43 = vpop.xlane.xlu1 %602 }
 0x80f   :  { %3596 = vrcp.f32 %v603_v43 }
 0x812   :  { %v712_v47 = vpop.permute.xlu1 %711 }
 0x813   :  { %v717_v49 = vsel %vm265_vm4, %v712_v47, 0 }
 0x816   :  { %v606_v44 = vpop.xlane.xlu0 %605  ;;  %v710_v56 = vpop.permute.xlu1 %709 }
 0x817   :  { %3598 = vrcp.f32 %v606_v44 }
 0x819   :  { %v3597_v45 = vpop.eup %3596 }
 0x81a   :  { %v609_v46 = vmul.f32 %v3597_v45, %v3591_v31  ;;  %v762_v53 = vpop.permute.xlu0 %761 }
 0x81b   :  { %v767_v57 = vsel %vm265_vm4, %v762_v53, 0 }
 0x81c   :  { %v611_v48 = vpack.c.bf16 %v609_v46, %v609_v46 }
 0x81e   :  { %3225 = vmatmul.mubr.msk.bf16.vlgmr.msra.gmra.mrb[24].mxu1 %vm265_vm4, %v611_v48  ;;  %v760_v61 = vpop.permute.xlu0 %759 }
 0x81f   :  { %3235 = vmatpush3.bf16.xpose.msra.mxu1 %v717_v49  ;;  %3236 = vmatprep.mubr.msk.bf16.mxu1 %vm3691_vm3, %v3690_v50 }
 0x820   :  { %3246 = vmatprep.subr.bf16.mxu1 %v3690_v50 }
 0x821   :  { %v3599_v51 = vpop.eup %3598 }
 0x822   :  { %v610_v52 = vmul.f32 %v3599_v51, %v3593_v34 }
 0x824   :  { %v612_v54 = vpack.c.bf16 %v610_v52, %v610_v52 }
 0x826   :  { %3231 = vmatmul.mubr.msk.bf16.vlgmr.msra.gmra.mrb[8].mxu0 %vm265_vm4, %v612_v54  ;;  %3237 = vmatmul.mubr.msk.bf16.vlgmr.msra.gmra.mrb[28].mxu1 %vm265_vm4, %v710_v56 }
 0x827   :  { %3241 = vmatpush3.bf16.xpose.msra.mxu0 %v767_v57  ;;  %3242 = vmatprep.mubr.msk.bf16.mxu0 %vm3691_vm3, %v3690_v50 }
 0x828   :  { %3252 = vmatprep.subr.bf16.mxu0 %v3690_v50  ;;  %3248 = vmatprep.mubr.msk.bf16.mxu1 %vm3691_vm3, %v3690_v50 }
 0x82e   :  { %3243 = vmatmul.mubr.msk.bf16.vlgmr.msra.gmra.mrb[12].mxu0 %vm265_vm4, %v760_v61 }
 0x82f   :  { %3254 = vmatprep.mubr.msk.bf16.mxu0 %vm3691_vm3, %v3690_v50 }
 0x860   :  { %v3976_v62 = vpop.f32.mrb[4].mxu0 }
 0x861   :  { %v3208_v63 = vpop.f32.mrb[5].mxu0 }
 0x862   :  { %v482_v1 = vpop.f32.mrb[6].mxu0 }
 0x863   :  { %v3209_v2 = vpop.f32.mrb[7].mxu0 }
 0x8f1   :  { %v3978_v3 = vpop.f32.mrb[24].mxu1 }
 0x8f2   :  { %v3226_v4 = vpop.f32.mrb[25].mxu1 }
 0x8f3   :  { %v658_v5 = vpop.f32.mrb[26].mxu1 }
 0x8f4   :  { %v3227_v6 = vpop.f32.mrb[27].mxu1 }
 0x8f9   :  { %v3980_v7 = vpop.f32.mrb[8].mxu0  ;;  %v753_v8 = vpop.f32.mrb[28].mxu1 }
 0x8fa   :  { %v3520_v9 = vpack.i.bf16 %v3980_v7, %v3978_v3  ;;  %v809_v11 = vmul.f32 0.17677669, %v753_v8  ;;  %v3232_v12 = vpop.f32.mrb[9].mxu0  ;;  %v3238_v14 = vpop.f32.mrb[29].mxu1 }
 0x8fb   :  { %v706_v15 = vpop.f32.mrb[10].mxu0  ;;  %v756_v16 = vpop.f32.mrb[30].mxu1 }
 0x8fc   :  { %v3233_v17 = vpop.f32.mrb[11].mxu0  ;;  %v3239_v18 = vpop.f32.mrb[31].mxu1  ;;  %v811_v19 = vadd.f32 %v809_v11, %v3896_v20 }
 0x8fe   :  { %v813_v21 = vsel %vm265_vm4, %v811_v19, -inf }
 0x8ff   :  { %814 = vmax.xlane.f32.xlu1 %v813_v21 }
 0x901   :  { %v803_v22 = vpop.f32.mrb[12].mxu0 }
 0x902   :  { %v810_v23 = vmul.f32 0.17677669, %v803_v22  ;;  %v3244_v24 = vpop.f32.mrb[13].mxu0 }
 0x903   :  { %v806_v25 = vpop.f32.mrb[14].mxu0 }
 0x904   :  { %v3245_v26 = vpop.f32.mrb[15].mxu0  ;;  %v812_v27 = vadd.f32 %v810_v23, %v3896_v20 }
 0x906   :  { %v816_v29 = vsel %vm265_vm4, %v812_v27, -inf }
 0x907   :  { %817 = vmax.xlane.f32.xlu0 %v816_v29 }
 0x910   :  { %885 = vrot.lane.b32.xlu1 %v3876_v13, %s3700_s26 }
 0x91d   :  { %837 = vrot.lane.b32.xlu0 %v3874_v10, %s3700_s26 }
 0x98c   :  { %v815_v30 = vpop.xlane.xlu1 %814 }
 0x98d   :  { %v819_v31 = vsub.f32 %v811_v19, %v815_v30 }
 0x98f   :  { %v821_v32 = vmul.f32 1.442695, %v819_v31 }
 0x990   :  { %v886_v28 = vpop.permute.xlu1 %885 }
 0x991   :  { %3600 = vpow2.f32 %v821_v32  ;;  %v891_v33 = vsel %vm393_vm6, %v886_v28, 0 }
 0x992   :  { %3253 = vmatpush3.bf16.msra.mxu0 %v891_v33 }
 0x993   :  { %3264 = vmatprep.subr.bf16.mxu0 %v3690_v50 }
 0x994   :  { %v818_v34 = vpop.xlane.xlu0 %817 }
 0x995   :  { %v820_v37 = vsub.f32 %v812_v27, %v818_v34 }
 0x997   :  { %v823_v38 = vmul.f32 1.442695, %v820_v37 }
 0x998   :  { %v838_v39 = vpop.permute.xlu0 %837 }
 0x999   :  { %3602 = vpow2.f32 %v823_v38  ;;  %v843_v40 = vsel %vm393_vm6, %v838_v39, 0 }
 0x99a   :  { %3247 = vmatpush3.bf16.msra.mxu1 %v843_v40 }
 0x99b   :  { %v3601_v41 = vpop.eup %3600  ;;  %3258 = vmatprep.subr.bf16.mxu1 %v3690_v50 }
 0x99c   :  { %v825_v42 = vsel %vm265_vm4, %v3601_v41, 0.0 }
 0x99d   :  { %826 = vadd.xlane.f32.xlu0 %v825_v42 }
 0x9a3   :  { %v3603_v43 = vpop.eup %3602 }
 0x9a4   :  { %v828_v44 = vsel %vm265_vm4, %v3603_v43, 0.0 }
 0x9a5   :  { %829 = vadd.xlane.f32.xlu1 %v828_v44 }
 0x9b3   :  { %985 = vrot.lane.b32.xlu0 %v3876_v13, %s3701_s27 }
 0x9b6   :  { %935 = vrot.lane.b32.xlu1 %v3874_v10, %s3701_s27 }
 0x9b7   :  { %983 = vrot.lane.b32.xlu0 %v3876_v13, %s3702_s28 }
 0x9ba   :  { %933 = vrot.lane.b32.xlu1 %v3874_v10, %s3702_s28 }
 0xa2a   :  { %v827_v45 = vpop.xlane.xlu0 %826 }
 0xa2b   :  { %3604 = vrcp.f32 %v827_v45 }
 0xa2e   :  { %v986_v56 = vpop.permute.xlu0 %985 }
 0xa2f   :  { %v991_v63 = vsel %vm265_vm4, %v986_v56, 0 }
 0xa32   :  { %v830_v46 = vpop.xlane.xlu1 %829  ;;  %v984_v1 = vpop.permute.xlu0 %983 }
 0xa33   :  { %3606 = vrcp.f32 %v830_v46 }
 0xa35   :  { %v3605_v47 = vpop.eup %3604 }
 0xa36   :  { %v833_v48 = vmul.f32 %v3605_v47, %v3601_v41  ;;  %v936_v49 = vpop.permute.xlu1 %935 }
 0xa37   :  { %v941_v52 = vsel %vm265_vm4, %v936_v49, 0 }
 0xa38   :  { %v835_v51 = vpack.c.bf16 %v833_v48, %v833_v48 }
 0xa3a   :  { %3249 = vmatmul.mubr.msk.bf16.vlgmr.msra.gmra.mrb[32].mxu1 %vm265_vm4, %v835_v51  ;;  %v934_v61 = vpop.permute.xlu1 %933  ;;  %v3552_v51 = vld [vmem:[%s4475_s4] sm:$0xff]  }
 0xa3b   :  { %3259 = vmatpush3.bf16.xpose.msra.mxu1 %v941_v52  ;;  %3260 = vmatprep.mubr.msk.bf16.mxu1 %vm3691_vm3, %v3690_v50 }
 0xa3c   :  { %3270 = vmatprep.subr.bf16.mxu1 %v3690_v50 }
 0xa3d   :  { %v3607_v53 = vpop.eup %3606 }
 0xa3e   :  { %v834_v54 = vmul.f32 %v3607_v53, %v3603_v43  ;;  %v3553_v53 = vld [vmem:[%s4475_s4 + $0x8] sm:$0xff]  }
 0xa40   :  { %v836_v57 = vpack.c.bf16 %v834_v54, %v834_v54 }
 0xa42   :  { %3255 = vmatmul.mubr.msk.bf16.vlgmr.msra.gmra.mrb[16].mxu0 %vm265_vm4, %v836_v57  ;;  %3261 = vmatmul.mubr.msk.bf16.vlgmr.msra.gmra.mrb[36].mxu1 %vm265_vm4, %v934_v61 }
 0xa43   :  { %3265 = vmatpush3.bf16.xpose.msra.mxu0 %v991_v63  ;;  %3266 = vmatprep.mubr.msk.bf16.mxu0 %vm3691_vm3, %v3690_v50 }
 0xa44   :  { %3276 = vmatprep.subr.bf16.mxu0 %v3690_v50  ;;  %3272 = vmatprep.mubr.msk.bf16.mxu1 %vm3691_vm3, %v3690_v50 }
 0xa4a   :  { %3267 = vmatmul.mubr.msk.bf16.vlgmr.msra.gmra.mrb[20].mxu0 %vm265_vm4, %v984_v1 }
 0xa4b   :  { %3278 = vmatprep.mubr.msk.bf16.mxu0 %vm3691_vm3, %v3690_v50 }
 0xb0d   :  { %v879_v2 = vpop.f32.mrb[32].mxu1 }
 0xb0e   :  { %v3250_v4 = vpop.f32.mrb[33].mxu1 }
 0xb0f   :  { %v882_v5 = vpop.f32.mrb[34].mxu1 }
 0xb10   :  { %v3251_v6 = vpop.f32.mrb[35].mxu1 }
 0xb15   :  { %v927_v8 = vpop.f32.mrb[16].mxu0  ;;  %v977_v11 = vpop.f32.mrb[36].mxu1 }
 0xb16   :  { %v3525_v12 = vpack.i.bf16 %v927_v8, %v879_v2  ;;  %v1033_v14 = vmul.f32 0.17677669, %v977_v11  ;;  %v3256_v15 = vpop.f32.mrb[17].mxu0  ;;  %v3262_v16 = vpop.f32.mrb[37].mxu1 }
 0xb17   :  { %v930_v17 = vpop.f32.mrb[18].mxu0  ;;  %v980_v18 = vpop.f32.mrb[38].mxu1 }
 0xb18   :  { %v3257_v19 = vpop.f32.mrb[19].mxu0  ;;  %v3263_v21 = vpop.f32.mrb[39].mxu1  ;;  %v1035_v22 = vadd.f32 %v1033_v14, %v3896_v20 }
 0xb1a   :  { %v1037_v23 = vsel %vm265_vm4, %v1035_v22, -inf }
 0xb1b   :  { %1038 = vmax.xlane.f32.xlu1 %v1037_v23 }
 0xb1d   :  { %v1027_v24 = vpop.f32.mrb[20].mxu0 }
 0xb1e   :  { %v1034_v25 = vmul.f32 0.17677669, %v1027_v24  ;;  %v3268_v26 = vpop.f32.mrb[21].mxu0 }
 0xb1f   :  { %v1030_v27 = vpop.f32.mrb[22].mxu0 }
 0xb20   :  { %v3269_v29 = vpop.f32.mrb[23].mxu0  ;;  %v1036_v30 = vadd.f32 %v1034_v25, %v3896_v20 }
 0xb22   :  { %v1040_v31 = vsel %vm265_vm4, %v1036_v30, -inf }
 0xb23   :  { %1041 = vmax.xlane.f32.xlu0 %v1040_v31 }
 0xba8   :  { %v1039_v32 = vpop.xlane.xlu1 %1038 }
 0xba9   :  { %v1043_v28 = vsub.f32 %v1035_v22, %v1039_v32 }
 0xbab   :  { %v1045_v33 = vmul.f32 1.442695, %v1043_v28 }
 0xbad   :  { %3608 = vpow2.f32 %v1045_v33 }
 0xbb0   :  { %v1042_v34 = vpop.xlane.xlu0 %1041 }
 0xbb1   :  { %v1044_v37 = vsub.f32 %v1036_v30, %v1042_v34 }
 0xbb3   :  { %v1047_v38 = vmul.f32 1.442695, %v1044_v37 }
 0xbb5   :  { %3610 = vpow2.f32 %v1047_v38 }
 0xbb7   :  { %v3609_v39 = vpop.eup %3608 }
 0xbb8   :  { %v1049_v40 = vsel %vm265_vm4, %v3609_v39, 0.0 }
 0xbb9   :  { %1050 = vadd.xlane.f32.xlu0 %v1049_v40 }
 0xbbf   :  { %v3611_v41 = vpop.eup %3610 }
 0xbc0   :  { %v1052_v42 = vsel %vm265_vm4, %v3611_v41, 0.0 }
 0xbc1   :  { %1053 = vadd.xlane.f32.xlu1 %v1052_v42 }
 0xbcf   :  { %1061 = vrot.lane.b32.xlu0 %v3874_v10, %s3703_s29 }
 0xbd2   :  { %1109 = vrot.lane.b32.xlu1 %v3876_v13, %s3703_s29 }
 0xbd3   :  { %3526 = vrot.lane.b32.xlu0 %v3525_v12, %s3704_s30 }
 0xbd6   :  { %3521 = vrot.lane.b32.xlu1 %v3520_v9, %s3705_s12 }
 0xc46   :  { %v1051_v43 = vpop.xlane.xlu0 %1050 }
 0xc47   :  { %3612 = vrcp.f32 %v1051_v43 }
 0xc4a   :  { %v1062_v44 = vpop.permute.xlu0 %1061 }
 0xc4b   :  { %v1067_v45 = vsel %vm393_vm6, %v1062_v44, 0 }
 0xc4c   :  { %3271 = vmatpush3.bf16.msra.mxu1 %v1067_v45 }
 0xc4d   :  { %3282 = vmatprep.subr.bf16.mxu1 %v3690_v50 }
 0xc4e   :  { %v1054_v10 = vpop.xlane.xlu1 %1053  ;;  %v3527_v11 = vpop.permute.xlu0 %3526 }
 0xc4f   :  { %3614 = vrcp.f32 %v1054_v10  ;;  %v3529_v15 = vunpack.i.h.bf16 %v3527_v11  ;;  %v3528_v16 = vunpack.i.l.bf16 %v3527_v11  ;;  %v3554_v10 = vld [vmem:[%s4476_s5] sm:$0xff]  }
 0xc51   :  { %v3613_v13 = vpop.eup %3612 }
 0xc52   :  { %v1057_v46 = vmul.f32 %v3613_v13, %v3609_v39  ;;  %v1110_v47 = vpop.permute.xlu1 %1109  ;;  %v3555_v13 = vld [vmem:[%s4476_s5 + $0x8] sm:$0xff]  }
 0xc53   :  { %v1115_v48 = vsel %vm393_vm6, %v1110_v47, 0  ;;  %v3557_v47 = vld [vmem:[%s4477_s6 + $0x8] sm:$0xff]  }
 0xc54   :  { %3277 = vmatpush3.bf16.msra.mxu0 %v1115_v48  ;;  %v1059_v49 = vpack.c.bf16 %v1057_v46, %v1057_v46  ;;  %v3556_v46 = vld [vmem:[%s4477_s6] sm:$0xff]   ;;  %v3558_v48 = vld [vmem:[%s4477_s6 + $0x10] sm:$0xff]  }
 0xc55   :  { %3290 = vmatprep.subr.bf16.mxu0 %v3690_v50 }
 0xc56   :  { %3273 = vmatmul.mubr.msk.bf16.vlgmr.msra.gmra.mrb[40].mxu1 %vm265_vm4, %v1059_v49  ;;  %v3522_v5 = vpop.permute.xlu1 %3521  ;;  %v3559_v49 = vld [vmem:[%s4477_s6 + $0x18] sm:$0xff]  }
 0xc57   :  { %3286 = vmatprep.mubr.msk.bf16.mxu1 %vm3691_vm3, %v3690_v50  ;;  %3283 = vmatpush3.bf16.msra.mxu1 %v3552_v51  ;;  %v3524_v6 = vunpack.i.h.bf16 %v3522_v5  ;;  %v3523_v8 = vunpack.i.l.bf16 %v3522_v5 }
 0xc58   :  { %3284 = vmatprep.subr.bf16.mxu1 %v3690_v50 }
 0xc59   :  { %v3615_v3 = vpop.eup %3614  ;;  %v1182_v12 = vsel %vm265_vm4, %v3976_v62, %v3524_v6  ;;  %v1181_v14 = vsel %vm265_vm4, %v3928_v55, %v3523_v8  ;;  %v1196_v55 = vsub.s32 4, %v3856_v58 }
 0xc5a   :  { %v1058_v7 = vmul.f32 %v3615_v3, %v3611_v41  ;;  %v1184_v21 = vsel %vm1183_vm7, %v1181_v14, %v3528_v16  ;;  %v1185_v22 = vsel %vm1183_vm7, %v1182_v12, %v3529_v15  ;;  %v3560_v3 = vld [vmem:[%s4477_s6 + $0x20] sm:$0xff]   ;;  %v3562_v16 = vld [vmem:[%s4477_s6 + $0x30] sm:$0xff]  }
 0xc5b   :  { %3285 = vmatpush3.bf16.msra.mxu1 %v3553_v53  ;;  %v1197_v62 = vrot.slane %v3862_v60, %v1196_v55 }
 0xc5c   :  { %v1060_v9 = vpack.c.bf16 %v1058_v7, %v1058_v7  ;;  %3298 = vmatprep.subr.bf16.mxu1 %v3690_v50  ;;  %v3561_v7 = vld [vmem:[%s4477_s6 + $0x28] sm:$0xff]  }
 0xc5e   :  { %3279 = vmatmul.mubr.msk.bf16.vlgmr.msra.gmra.mrb[24].mxu0 %vm265_vm4, %v1060_v9 }
 0xc5f   :  { %3294 = vmatprep.mubr.msk.bf16.mxu0 %vm3691_vm3, %v3690_v50  ;;  %3291 = vmatpush3.bf16.msra.mxu0 %v3554_v10 }
 0xc60   :  { %3292 = vmatprep.subr.bf16.mxu0 %v3690_v50 }
 0xc63   :  { %3293 = vmatpush3.bf16.msra.mxu0 %v3555_v13 }
 0xc64   :  { %3318 = vmatprep.subr.bf16.mxu0 %v3690_v50 }
 0xd29   :  { %v1103_v52 = vpop.f32.mrb[40].mxu1 }
 0xd2a   :  { %v3274_v54 = vpop.f32.mrb[41].mxu1 }
 0xd2b   :  { %v1106_v56 = vpop.f32.mrb[42].mxu1 }
 0xd2c   :  { %v3275_v57 = vpop.f32.mrb[43].mxu1 }
 0xd2d   :  { %v1284_v57 = vsub.s32 2, %v3856_v58 }
 0xd31   :  { %v1151_v61 = vpop.f32.mrb[24].mxu0 }
 0xd32   :  { %v3530_v63 = vpack.i.bf16 %v1151_v61, %v1103_v52  ;;  %v3280_v1 = vpop.f32.mrb[25].mxu0 }
 0xd33   :  { %v1154_v2 = vpop.f32.mrb[26].mxu0 }
 0xd34   :  { %v3281_v4 = vpop.f32.mrb[27].mxu0  ;;  %3531 = vrot.lane.b32.xlu1 %v3530_v63, %s3706_s15  ;;  %v1285_v63 = vrot.slane %v3862_v60, %v1284_v57  ;;  %v1290_v2 = vsub.s32 3, %v3856_v58 }
 0xd36   :  { %v1291_v8 = vrot.slane %v3862_v60, %v1290_v2 }
 0xda6   :  { %v3532_v17 = vpop.permute.xlu1 %3531 }
 0xda7   :  { %v3534_v18 = vunpack.i.h.bf16 %v3532_v17  ;;  %v3533_v19 = vunpack.i.l.bf16 %v3532_v17  ;;  %v3563_v17 = vld [vmem:[%s4477_s6 + $0x38] sm:$0xff]  }
 0xda9   :  { %v1188_v23 = vsel %vm1186_vm8, %v1185_v22, %v3534_v18  ;;  %v1187_v24 = vsel %vm1186_vm8, %v1184_v21, %v3533_v19  ;;  %v2936_v18 = vld [vmem:[%s4479_s8] ss:$0 sm:$0xff] }
 0xdaa   :  { %v1189_v25 = vpack.c.bf16 %v1188_v23, %v1187_v24 }
 0xdac   :  { %3287 = vmatmul.mubr.msk.bf16.vlgmr.msra.gmra.mrb[44].mxu1 %vm156_vm2, %v1189_v25 }
 0xdad   :  { %3314 = vmatprep.mubr.msk.bf16.mxu1 %vm3691_vm3, %v3690_v50  ;;  %3299 = vmatpush3.bf16.msra.mxu1 %v3556_v46 }
 0xdae   :  { %3300 = vmatprep.subr.bf16.mxu1 %v3690_v50 }
 0xdb1   :  { %3301 = vmatpush3.bf16.msra.mxu1 %v3557_v47  ;;  %v3564_v47 = vld [vmem:[%s4474_s3 + $0x10] sm:$0xff]  }
 0xdb2   :  { %3302 = vmatprep.subr.bf16.mxu1 %v3690_v50 }
 0xdb5   :  { %3303 = vmatpush3.bf16.msra.mxu1 %v3558_v48  ;;  %v3565_v48 = vld [vmem:[%s4474_s3 + $0x18] sm:$0xff]  }
 0xdb6   :  { %3304 = vmatprep.subr.bf16.mxu1 %v3690_v50 }
 0xdb9   :  { %3305 = vmatpush3.bf16.msra.mxu1 %v3559_v49 }
 0xdba   :  { %3306 = vmatprep.subr.bf16.mxu1 %v3690_v50 }
 0xdbd   :  { %3307 = vmatpush3.bf16.msra.mxu1 %v3560_v3 }
 0xdbe   :  { %3308 = vmatprep.subr.bf16.mxu1 %v3690_v50 }
 0xdc1   :  { %3309 = vmatpush3.bf16.msra.mxu1 %v3561_v7 }
 0xdc2   :  { %3310 = vmatprep.subr.bf16.mxu1 %v3690_v50 }
 0xdc5   :  { %3311 = vmatpush3.bf16.msra.mxu1 %v3562_v16 }
 0xdc6   :  { %3312 = vmatprep.subr.bf16.mxu1 %v3690_v50 }
 0xdc9   :  { %3313 = vmatpush3.bf16.msra.mxu1 %v3563_v17 }
 0xdca   :  { %3344 = vmatprep.subr.bf16.mxu1 %v3690_v50 }
 0xe7f   :  { %v1247_v26 = vpop.f32.mrb[44].mxu1 }
 0xe80   :  { %v1248_v27 = vadd.f32 %v1247_v26, %v1197_v62  ;;  %v3288_v29 = vpop.f32.mrb[45].mxu1 }
 0xe81   :  { %v1250_v30 = vpop.f32.mrb[46].mxu1  ;;  %v1382_v29 = vsub.s32 5, %v3856_v58 }
 0xe82   :  { %v4072_v31 = vadd.f32 %v1248_v27, %v3830_v35  ;;  %v1251_v32 = vadd.f32 %v1250_v30, %v1197_v62  ;;  %v3289_v28 = vpop.f32.mrb[47].mxu1 }
 0xe83   :  { %v1383_v30 = vrot.slane %v3862_v60, %v1382_v29 }
 0xe84   :  { %v4075_v33 = vadd.f32 %v1251_v32, %v3832_v36  ;;  %v1256_v34 = vsel %vm156_vm2, %v4072_v31, 0.0 }
 0xe85   :  { %1257 = vadd.xlane.f32.xlu0 %v1256_v34 }
 0xe86   :  { %v1259_v37 = vsel %vm156_vm2, %v4075_v33, 0.0 }
 0xe87   :  { %1260 = vadd.xlane.f32.xlu1 %v1259_v37 }
 0xf12   :  { %v1258_v38 = vpop.xlane.xlu0 %1257 }
 0xf13   :  { %v1262_v39 = vmul.f32 0.03125, %v1258_v38 }
 0xf14   :  { %v1261_v40 = vpop.xlane.xlu1 %1260 }
 0xf15   :  { %v1264_v41 = vsub.f32 %v4072_v31, %v1262_v39  ;;  %v1263_v35 = vmul.f32 0.03125, %v1261_v40 }
 0xf17   :  { %v1265_v42 = vsub.f32 %v4075_v33, %v1263_v35  ;;  %v1266_v43 = vmul.f32 %v1264_v41, %v1264_v41 }
 0xf19   :  { %v1268_v36 = vsel %vm156_vm2, %v1266_v43, 0.0  ;;  %v1267_v44 = vmul.f32 %v1265_v42, %v1265_v42 }
 0xf1a   :  { %1269 = vadd.xlane.f32.xlu0 %v1268_v36 }
 0xf1b   :  { %v1271_v45 = vsel %vm156_vm2, %v1267_v44, 0.0 }
 0xf1e   :  { %1272 = vadd.xlane.f32.xlu0 %v1271_v45 }
 0xfa7   :  { %v1270_v9 = vpop.xlane.xlu0 %1269 }
 0xfa8   :  { %v1274_v51 = vmul.f32 0.03125, %v1270_v9 }
 0xfaa   :  { %v1276_v52 = vadd.f32 1e-05, %v1274_v51 }
 0xfab   :  { %v1273_v53 = vpop.xlane.xlu0 %1272 }
 0xfac   :  { %3616 = vrsqrt.f32 %v1276_v52  ;;  %v1275_v54 = vmul.f32 0.03125, %v1273_v53  ;;  %v4170_v53 = vld [vmem:[%s4478_s7 + $0x8] sm:$0xff] }
 0xfae   :  { %v1277_v56 = vadd.f32 1e-05, %v1275_v54  ;;  %v1508_v54 = vrot.slane %v4170_v53, %v186_v59 }
 0xfb0   :  { %3618 = vrsqrt.f32 %v1277_v56 }
 0xfb6   :  { %v3617_v61 = vpop.eup %3616 }
 0xfb7   :  { %v1280_v1 = vmul.f32 %v3617_v61, %v1264_v41 }
 0xfb9   :  { %v1286_v5 = vmul.f32 %v1285_v63, %v1280_v1  ;;  %v1514_v1 = vrot.slane %v4170_v53, %v192_v0 }
 0xfba   :  { %v3619_v4 = vpop.eup %3618 }
 0xfbb   :  { %v1281_v6 = vmul.f32 %v3619_v4, %v1265_v42  ;;  %v1292_v12 = vadd.f32 %v1291_v8, %v1286_v5 }
 0xfbd   :  { %v1287_v11 = vmul.f32 %v1285_v63, %v1281_v6 }
 0xfbf   :  { %v1293_v14 = vadd.f32 %v1291_v8, %v1287_v11 }
 0xfc1   :  { %v1294_v15 = vpack.c.bf16 %v1293_v14, %v1292_v12 }
 0xfc3   :  { %3295 = vmatmul.mubr.msk.bf16.vlgmr.msra.gmra.mrb[28].mxu0 %vm156_vm2, %v1294_v15 }
 0xfc4   :  { %3322 = vmatprep.mubr.msk.bf16.mxu0 %vm3691_vm3, %v3690_v50  ;;  %3319 = vmatpush3.bf16.msra.mxu0 %v3564_v47 }
 0xfc5   :  { %3320 = vmatprep.subr.bf16.mxu0 %v3690_v50 }
 0xfc8   :  { %3321 = vmatpush3.bf16.msra.mxu0 %v3565_v48 }
 0xfc9   :  { %3326 = vmatprep.subr.bf16.mxu0 %v3690_v50 }
0x1096   :  { %v1354_v19 = vpop.f32.mrb[28].mxu0 }
0x1097   :  { %v1355_v21 = vadd.f32 %v2936_v18, %v1354_v19  ;;  %v3296_v22 = vpop.f32.mrb[29].mxu0 }
0x1098   :  { %v1357_v23 = vpop.f32.mrb[30].mxu0 }
0x1099   :  { %v1358_v24 = vadd.f32 %v2936_v18, %v1357_v23  ;;  %v3297_v25 = vpop.f32.mrb[31].mxu0  ;;  %v1361_v62 = vmax.f32 %v1355_v21, 0.0 }
0x109b   :  { %v1362_v26 = vmax.f32 %v1358_v24, 0.0 }
0x109d   :  { %v1363_v27 = vpack.c.bf16 %v1362_v26, %v1361_v62 }
0x109f   :  { %3315 = vmatmul.mubr.bf16.vlgmr.msra.gmra.mrb[48].mxu1 %v1363_v27 }
0x10a0   :  { %3346 = vmatprep.mubr.msk.bf16.mxu1 %vm3691_vm3, %v3690_v50 }
0x1172   :  { %v1466_v32 = vpop.f32.mrb[48].mxu1 }
0x1173   :  { %v1467_v28 = vadd.f32 %v1466_v32, %v1383_v30  ;;  %v3316_v34 = vpop.f32.mrb[49].mxu1 }
0x1174   :  { %v1469_v37 = vpop.f32.mrb[50].mxu1 }
0x1175   :  { %v4146_v38 = vadd.f32 %v1467_v28, %v4072_v31  ;;  %v1470_v39 = vadd.f32 %v1469_v37, %v1383_v30  ;;  %v3317_v40 = vpop.f32.mrb[51].mxu1 }
0x1177   :  { %v4149_v41 = vadd.f32 %v1470_v39, %v4075_v33  ;;  %v1479_v35 = vsel %vm156_vm2, %v4146_v38, 0.0 }
0x1178   :  { %1480 = vadd.xlane.f32.xlu1 %v1479_v35 }
0x1179   :  { %v1482_v42 = vsel %vm156_vm2, %v4149_v41, 0.0 }
0x117a   :  { %1483 = vadd.xlane.f32.xlu0 %v1482_v42 }
0x1205   :  { %v1481_v60 = vpop.xlane.xlu1 %1480 }
0x1206   :  { %v1485_v43 = vmul.f32 0.03125, %v1481_v60 }
0x1207   :  { %v1484_v36 = vpop.xlane.xlu0 %1483 }
0x1208   :  { %v1487_v44 = vsub.f32 %v4146_v38, %v1485_v43  ;;  %v1486_v31 = vmul.f32 0.03125, %v1484_v36 }
0x120a   :  { %v1488_v45 = vsub.f32 %v4149_v41, %v1486_v31  ;;  %v1489_v10 = vmul.f32 %v1487_v44, %v1487_v44 }
0x120c   :  { %v1491_v33 = vsel %vm156_vm2, %v1489_v10, 0.0  ;;  %v1490_v13 = vmul.f32 %v1488_v45, %v1488_v45 }
0x120d   :  { %1492 = vadd.xlane.f32.xlu1 %v1491_v33 }
0x120e   :  { %v1494_v46 = vsel %vm156_vm2, %v1490_v13, 0.0 }
0x120f   :  { %1495 = vadd.xlane.f32.xlu0 %v1494_v46 }
0x129a   :  { %v1493_v49 = vpop.xlane.xlu1 %1492 }
0x129b   :  { %v1497_v3 = vmul.f32 0.03125, %v1493_v49 }
0x129c   :  { %v1496_v7 = vpop.xlane.xlu0 %1495 }
0x129d   :  { %v1499_v9 = vadd.f32 1e-05, %v1497_v3  ;;  %v1498_v51 = vmul.f32 0.03125, %v1496_v7 }
0x129f   :  { %3620 = vrsqrt.f32 %v1499_v9  ;;  %v1500_v52 = vadd.f32 1e-05, %v1498_v51 }
0x12a1   :  { %3622 = vrsqrt.f32 %v1500_v52 }
0x12a9   :  { %v3621_v56 = vpop.eup %3620 }
0x12aa   :  { %v1503_v61 = vmul.f32 %v3621_v56, %v1487_v44 }
0x12ab   :  { %v3623_v63 = vpop.eup %3622 }
0x12ac   :  { %v1509_v4 = vmul.f32 %v1508_v54, %v1503_v61  ;;  %v1504_v5 = vmul.f32 %v3623_v63, %v1488_v45 }
0x12ae   :  { %v1510_v6 = vmul.f32 %v1508_v54, %v1504_v5  ;;  %v1515_v8 = vadd.f32 %v1514_v1, %v1509_v4 }
0x12b0   :  { %v1516_v11 = vadd.f32 %v1514_v1, %v1510_v6 }
0x12b2   :  { %v1517_v12 = vpack.c.bf16 %v1516_v11, %v1515_v8 }
0x12b4   :  { %3323 = vmatmul.mubr.msk.bf16.vlgmr.msra.gmra.mrb[32].mxu0 %vm156_vm2, %v1517_v12 }
0x12b5   :  { %3328 = vmatprep.mubr.msk.bf16.mxu0 %vm3691_vm3, %v3690_v50 }
0x1387   :  { %v1572_v14 = vpop.f32.mrb[32].mxu0 }
0x1388   :  { %v4181_v59 = vpack.c.bf16 %v1572_v14, %v1572_v14  ;;  %v3324_v15 = vpop.f32.mrb[33].mxu0 }
0x1389   :  { %v1575_v16 = vpop.f32.mrb[34].mxu0 }
0x138a   :  { %v4183_v17 = vpack.c.bf16 %v1575_v16, %v1575_v16  ;;  %1585 = vrot.lane.b32.xlu1 %v4181_v59, %s3692_s19  ;;  %v3325_v0 = vpop.f32.mrb[35].mxu0 }
0x138c   :  { %1633 = vrot.lane.b32.xlu0 %v4183_v17, %s3692_s19 }
0x13fc   :  { %v1586_v18 = vpop.permute.xlu1 %1585 }
0x13fd   :  { %v1591_v19 = vsel %vm265_vm4, %v1586_v18, 0 }
0x13fe   :  { %3327 = vmatpush3.bf16.xpose.msra.mxu0 %v1591_v19  ;;  %v1634_v21 = vpop.permute.xlu0 %1633 }
0x13ff   :  { %3332 = vmatprep.subr.bf16.mxu0 %v3690_v50  ;;  %v1639_v22 = vsel %vm265_vm4, %v1634_v21, 0 }
0x1405   :  { %3329 = vmatmul.mubr.msk.bf16.vlgmr.msra.gmra.mrb[36].mxu0 %vm265_vm4, %v4181_v59 }
0x1406   :  { %3333 = vmatpush3.bf16.xpose.msra.mxu0 %v1639_v22  ;;  %3334 = vmatprep.mubr.msk.bf16.mxu0 %vm3691_vm3, %v3690_v50 }
0x1407   :  { %3338 = vmatprep.subr.bf16.mxu0 %v3690_v50 }
0x140d   :  { %3335 = vmatmul.mubr.msk.bf16.vlgmr.msra.gmra.mrb[40].mxu0 %vm265_vm4, %v4183_v17 }
0x140e   :  { %3340 = vmatprep.mubr.msk.bf16.mxu0 %vm3691_vm3, %v3690_v50 }
0x14d8   :  { %v1627_v23 = vpop.f32.mrb[36].mxu0 }
0x14d9   :  { %v1681_v24 = vmul.f32 0.17677669, %v1627_v23  ;;  %v3330_v25 = vpop.f32.mrb[37].mxu0 }
0x14da   :  { %v1630_v62 = vpop.f32.mrb[38].mxu0 }
0x14db   :  { %v3331_v26 = vpop.f32.mrb[39].mxu0  ;;  %v1683_v27 = vadd.f32 %v1681_v24, %v3896_v20 }
0x14dd   :  { %v1685_v30 = vsel %vm265_vm4, %v1683_v27, -inf }
0x14de   :  { %1686 = vmax.xlane.f32.xlu1 %v1685_v30 }
0x14e0   :  { %v1675_v32 = vpop.f32.mrb[40].mxu0 }
0x14e1   :  { %v1682_v28 = vmul.f32 0.17677669, %v1675_v32  ;;  %v3336_v34 = vpop.f32.mrb[41].mxu0 }
0x14e2   :  { %v1678_v37 = vpop.f32.mrb[42].mxu0 }
0x14e3   :  { %v3337_v39 = vpop.f32.mrb[43].mxu0  ;;  %v1684_v40 = vadd.f32 %v1682_v28, %v3896_v20 }
0x14e5   :  { %v1688_v35 = vsel %vm265_vm4, %v1684_v40, -inf }
0x14e6   :  { %1689 = vmax.xlane.f32.xlu0 %v1688_v35 }
0x14ef   :  { %1709 = vrot.lane.b32.xlu1 %v4181_v59, %s3695_s21 }
0x156b   :  { %v1687_v42 = vpop.xlane.xlu1 %1686 }
0x156c   :  { %v1691_v60 = vsub.f32 %v1683_v27, %v1687_v42 }
0x156e   :  { %v1693_v43 = vmul.f32 1.442695, %v1691_v60 }
0x156f   :  { %v1710_v36 = vpop.permute.xlu1 %1709 }
0x1570   :  { %3624 = vpow2.f32 %v1693_v43  ;;  %v1715_v44 = vsel %vm393_vm6, %v1710_v36, 0 }
0x1571   :  { %3339 = vmatpush3.bf16.msra.mxu0 %v1715_v44 }
0x1572   :  { %3350 = vmatprep.subr.bf16.mxu0 %v3690_v50 }
0x1573   :  { %v1690_v31 = vpop.xlane.xlu0 %1689 }
0x1574   :  { %v1692_v45 = vsub.f32 %v1684_v40, %v1690_v31 }
0x1576   :  { %v1695_v10 = vmul.f32 1.442695, %v1692_v45 }
0x1578   :  { %3626 = vpow2.f32 %v1695_v10 }
0x157a   :  { %v3625_v33 = vpop.eup %3624 }
0x157b   :  { %v1697_v13 = vsel %vm265_vm4, %v3625_v33, 0.0 }
0x157c   :  { %1698 = vadd.xlane.f32.xlu1 %v1697_v13 }
0x1582   :  { %v3627_v46 = vpop.eup %3626 }
0x1583   :  { %v1700_v47 = vsel %vm265_vm4, %v3627_v46, 0.0 }
0x1584   :  { %1701 = vadd.xlane.f32.xlu0 %v1700_v47 }
0x158d   :  { %1807 = vrot.lane.b32.xlu1 %v4181_v59, %s3694_s20 }
0x1591   :  { %1857 = vrot.lane.b32.xlu1 %v4183_v17, %s3694_s20 }
0x1595   :  { %1855 = vrot.lane.b32.xlu1 %v4183_v17, %s3696_s22 }
0x159a   :  { %1757 = vrot.lane.b32.xlu0 %v4183_v17, %s3695_s21 }
0x159e   :  { %1805 = vrot.lane.b32.xlu0 %v4181_v59, %s3696_s22 }
0x1609   :  { %v1699_v48 = vpop.xlane.xlu1 %1698 }
0x160a   :  { %3628 = vrcp.f32 %v1699_v48 }
0x160d   :  { %v1808_v51 = vpop.permute.xlu1 %1807 }
0x160e   :  { %v1813_v56 = vsel %vm265_vm4, %v1808_v51, 0 }
0x1611   :  { %v1702_v49 = vpop.xlane.xlu0 %1701  ;;  %v1858_v1 = vpop.permute.xlu1 %1857 }
0x1612   :  { %3630 = vrcp.f32 %v1702_v49  ;;  %v1863_v6 = vsel %vm265_vm4, %v1858_v1, 0 }
0x1614   :  { %v3629_v3 = vpop.eup %3628 }
0x1615   :  { %v1705_v7 = vmul.f32 %v3629_v3, %v3625_v33  ;;  %v1758_v9 = vpop.permute.xlu0 %1757  ;;  %v1856_v8 = vpop.permute.xlu1 %1855 }
0x1616   :  { %v1763_v52 = vsel %vm393_vm6, %v1758_v9, 0 }
0x1617   :  { %3345 = vmatpush3.bf16.msra.mxu1 %v1763_v52  ;;  %v1707_v54 = vpack.c.bf16 %v1705_v7, %v1705_v7 }
0x1618   :  { %3356 = vmatprep.subr.bf16.mxu1 %v3690_v50 }
0x1619   :  { %3341 = vmatmul.mubr.msk.bf16.vlgmr.msra.gmra.mrb[44].mxu0 %vm265_vm4, %v1707_v54  ;;  %v1806_v5 = vpop.permute.xlu0 %1805 }
0x161a   :  { %3351 = vmatpush3.bf16.xpose.msra.mxu0 %v1813_v56  ;;  %3352 = vmatprep.mubr.msk.bf16.mxu0 %vm3691_vm3, %v3690_v50 }
0x161b   :  { %3362 = vmatprep.subr.bf16.mxu0 %v3690_v50 }
0x161c   :  { %v3631_v61 = vpop.eup %3630 }
0x161d   :  { %v1706_v63 = vmul.f32 %v3631_v61, %v3627_v46 }
0x161f   :  { %v1708_v4 = vpack.c.bf16 %v1706_v63, %v1706_v63 }
0x1621   :  { %3347 = vmatmul.mubr.msk.bf16.vlgmr.msra.gmra.mrb[52].mxu1 %vm265_vm4, %v1708_v4  ;;  %3353 = vmatmul.mubr.msk.bf16.vlgmr.msra.gmra.mrb[48].mxu0 %vm265_vm4, %v1806_v5 }
0x1622   :  { %3357 = vmatpush3.bf16.xpose.msra.mxu1 %v1863_v6  ;;  %3358 = vmatprep.mubr.msk.bf16.mxu1 %vm3691_vm3, %v3690_v50 }
0x1623   :  { %3368 = vmatprep.subr.bf16.mxu1 %v3690_v50  ;;  %3364 = vmatprep.mubr.msk.bf16.mxu0 %vm3691_vm3, %v3690_v50 }
0x1629   :  { %3359 = vmatmul.mubr.msk.bf16.vlgmr.msra.gmra.mrb[56].mxu1 %vm265_vm4, %v1856_v8 }
0x162a   :  { %3370 = vmatprep.mubr.msk.bf16.mxu1 %vm3691_vm3, %v3690_v50 }
0x16ec   :  { %v4239_v11 = vpop.f32.mrb[44].mxu0 }
0x16ed   :  { %v3342_v12 = vpop.f32.mrb[45].mxu0 }
0x16ee   :  { %v1754_v14 = vpop.f32.mrb[46].mxu0 }
0x16ef   :  { %v3343_v15 = vpop.f32.mrb[47].mxu0 }
0x16f4   :  { %v4241_v16 = vpop.f32.mrb[52].mxu1  ;;  %v1849_v0 = vpop.f32.mrb[48].mxu0 }
0x16f5   :  { %v1905_v18 = vmul.f32 0.17677669, %v1849_v0  ;;  %v3348_v19 = vpop.f32.mrb[53].mxu1  ;;  %v3354_v21 = vpop.f32.mrb[49].mxu0 }
0x16f6   :  { %v1802_v22 = vpop.f32.mrb[54].mxu1  ;;  %v1852_v23 = vpop.f32.mrb[50].mxu0 }
0x16f7   :  { %v3349_v24 = vpop.f32.mrb[55].mxu1  ;;  %v3355_v25 = vpop.f32.mrb[51].mxu0  ;;  %v1907_v62 = vadd.f32 %v1905_v18, %v3896_v20 }
0x16f9   :  { %v1909_v26 = vsel %vm265_vm4, %v1907_v62, -inf }
0x16fa   :  { %1910 = vmax.xlane.f32.xlu0 %v1909_v26 }
0x16fc   :  { %v1899_v27 = vpop.f32.mrb[56].mxu1 }
0x16fd   :  { %v1906_v30 = vmul.f32 0.17677669, %v1899_v27  ;;  %v3360_v32 = vpop.f32.mrb[57].mxu1 }
0x16fe   :  { %v1902_v28 = vpop.f32.mrb[58].mxu1 }
0x16ff   :  { %v3361_v34 = vpop.f32.mrb[59].mxu1  ;;  %v1908_v37 = vadd.f32 %v1906_v30, %v3896_v20 }
0x1701   :  { %v1912_v39 = vsel %vm265_vm4, %v1908_v37, -inf }
0x1702   :  { %1913 = vmax.xlane.f32.xlu1 %v1912_v39 }
0x1713   :  { %1933 = vrot.lane.b32.xlu1 %v4181_v59, %s3697_s23 }
0x1717   :  { %2031 = vrot.lane.b32.xlu1 %v4181_v59, %s3698_s24 }
0x171b   :  { %2081 = vrot.lane.b32.xlu1 %v4183_v17, %s3698_s24 }
0x171f   :  { %2079 = vrot.lane.b32.xlu1 %v4183_v17, %s3699_s25 }
0x1787   :  { %v1911_v40 = vpop.xlane.xlu0 %1910 }
0x1788   :  { %v1915_v35 = vsub.f32 %v1907_v62, %v1911_v40 }
0x178a   :  { %v1917_v42 = vmul.f32 1.442695, %v1915_v35 }
0x178c   :  { %3632 = vpow2.f32 %v1917_v42 }
0x178f   :  { %v1914_v60 = vpop.xlane.xlu1 %1913 }
0x1790   :  { %v1916_v43 = vsub.f32 %v1908_v37, %v1914_v60 }
0x1792   :  { %v1919_v36 = vmul.f32 1.442695, %v1916_v43 }
0x1793   :  { %v1934_v44 = vpop.permute.xlu1 %1933 }
0x1794   :  { %3634 = vpow2.f32 %v1919_v36  ;;  %v1939_v31 = vsel %vm393_vm6, %v1934_v44, 0 }
0x1795   :  { %3363 = vmatpush3.bf16.msra.mxu0 %v1939_v31 }
0x1796   :  { %v3633_v45 = vpop.eup %3632  ;;  %3374 = vmatprep.subr.bf16.mxu0 %v3690_v50 }
0x1797   :  { %v1921_v10 = vsel %vm265_vm4, %v3633_v45, 0.0  ;;  %v2032_v7 = vpop.permute.xlu1 %2031 }
0x1798   :  { %1922 = vadd.xlane.f32.xlu0 %v1921_v10  ;;  %v2037_v52 = vsel %vm265_vm4, %v2032_v7, 0 }
0x179b   :  { %v2082_v61 = vpop.permute.xlu1 %2081 }
0x179c   :  { %v2087_v4 = vsel %vm265_vm4, %v2082_v61, 0 }
0x179e   :  { %v3635_v33 = vpop.eup %3634 }
0x179f   :  { %v1924_v13 = vsel %vm265_vm4, %v3635_v33, 0.0  ;;  %v2080_v5 = vpop.permute.xlu1 %2079 }
0x17a0   :  { %1925 = vadd.xlane.f32.xlu0 %v1924_v13 }
0x17b6   :  { %1981 = vrot.lane.b32.xlu0 %v4183_v17, %s3697_s23 }
0x17ba   :  { %2029 = vrot.lane.b32.xlu0 %v4181_v59, %s3699_s25 }
0x1825   :  { %v1923_v46 = vpop.xlane.xlu0 %1922 }
0x1826   :  { %3636 = vrcp.f32 %v1923_v46 }
0x182d   :  { %v1926_v47 = vpop.xlane.xlu0 %1925 }
0x182e   :  { %3638 = vrcp.f32 %v1926_v47 }
0x1830   :  { %v3637_v48 = vpop.eup %3636 }
0x1831   :  { %v1929_v49 = vmul.f32 %v3637_v48, %v3633_v45  ;;  %v1982_v3 = vpop.permute.xlu0 %1981 }
0x1832   :  { %v1987_v9 = vsel %vm393_vm6, %v1982_v3, 0 }
0x1833   :  { %3369 = vmatpush3.bf16.msra.mxu1 %v1987_v9  ;;  %v1931_v51 = vpack.c.bf16 %v1929_v49, %v1929_v49 }
0x1834   :  { %3380 = vmatprep.subr.bf16.mxu1 %v3690_v50 }
0x1835   :  { %3365 = vmatmul.mubr.msk.bf16.vlgmr.msra.gmra.mrb[52].mxu0 %vm265_vm4, %v1931_v51  ;;  %v2030_v1 = vpop.permute.xlu0 %2029 }
0x1836   :  { %3375 = vmatpush3.bf16.xpose.msra.mxu0 %v2037_v52  ;;  %3376 = vmatprep.mubr.msk.bf16.mxu0 %vm3691_vm3, %v3690_v50 }
0x1837   :  { %3386 = vmatprep.subr.bf16.mxu0 %v3690_v50 }
0x1838   :  { %v3639_v54 = vpop.eup %3638 }
0x1839   :  { %v1930_v56 = vmul.f32 %v3639_v54, %v3635_v33 }
0x183b   :  { %v1932_v63 = vpack.c.bf16 %v1930_v56, %v1930_v56 }
0x183d   :  { %3371 = vmatmul.mubr.msk.bf16.vlgmr.msra.gmra.mrb[60].mxu1 %vm265_vm4, %v1932_v63  ;;  %3377 = vmatmul.mubr.msk.bf16.vlgmr.msra.gmra.mrb[56].mxu0 %vm265_vm4, %v2030_v1 }
0x183e   :  { %3381 = vmatpush3.bf16.xpose.msra.mxu1 %v2087_v4  ;;  %3382 = vmatprep.mubr.msk.bf16.mxu1 %vm3691_vm3, %v3690_v50 }
0x183f   :  { %3392 = vmatprep.subr.bf16.mxu1 %v3690_v50  ;;  %3388 = vmatprep.mubr.msk.bf16.mxu0 %vm3691_vm3, %v3690_v50 }
0x1845   :  { %3383 = vmatmul.mubr.msk.bf16.vlgmr.msra.gmra.mrb[64].mxu1 %vm265_vm4, %v2080_v5 }
0x1846   :  { %3394 = vmatprep.mubr.msk.bf16.mxu1 %vm3691_vm3, %v3690_v50 }
0x1908   :  { %v4281_v6 = vpop.f32.mrb[52].mxu0 }
0x1909   :  { %v3366_v8 = vpop.f32.mrb[53].mxu0 }
0x190a   :  { %v1978_v12 = vpop.f32.mrb[54].mxu0 }
0x190b   :  { %v3367_v14 = vpop.f32.mrb[55].mxu0 }
0x1910   :  { %v4283_v15 = vpop.f32.mrb[60].mxu1  ;;  %v2073_v0 = vpop.f32.mrb[56].mxu0 }
0x1911   :  { %v3535_v18 = vpack.i.bf16 %v4283_v15, %v4281_v6  ;;  %v2129_v19 = vmul.f32 0.17677669, %v2073_v0  ;;  %v3372_v21 = vpop.f32.mrb[61].mxu1  ;;  %v3378_v22 = vpop.f32.mrb[57].mxu0 }
0x1912   :  { %v2026_v23 = vpop.f32.mrb[62].mxu1  ;;  %v2076_v24 = vpop.f32.mrb[58].mxu0 }
0x1913   :  { %v3373_v25 = vpop.f32.mrb[63].mxu1  ;;  %v3379_v62 = vpop.f32.mrb[59].mxu0  ;;  %v2131_v26 = vadd.f32 %v2129_v19, %v3896_v20 }
0x1915   :  { %v2133_v27 = vsel %vm265_vm4, %v2131_v26, -inf }
0x1916   :  { %2134 = vmax.xlane.f32.xlu0 %v2133_v27 }
0x1918   :  { %v2123_v30 = vpop.f32.mrb[64].mxu1 }
0x1919   :  { %v2130_v32 = vmul.f32 0.17677669, %v2123_v30  ;;  %v3384_v28 = vpop.f32.mrb[65].mxu1 }
0x191a   :  { %v2126_v34 = vpop.f32.mrb[66].mxu1 }
0x191b   :  { %v3385_v37 = vpop.f32.mrb[67].mxu1  ;;  %v2132_v39 = vadd.f32 %v2130_v32, %v3896_v20 }
0x191d   :  { %v2136_v40 = vsel %vm265_vm4, %v2132_v39, -inf }
0x191e   :  { %2137 = vmax.xlane.f32.xlu1 %v2136_v40 }
0x192f   :  { %2157 = vrot.lane.b32.xlu1 %v4181_v59, %s3700_s26 }
0x1933   :  { %2255 = vrot.lane.b32.xlu1 %v4181_v59, %s3701_s27 }
0x1937   :  { %2305 = vrot.lane.b32.xlu1 %v4183_v17, %s3701_s27 }
0x193b   :  { %2303 = vrot.lane.b32.xlu1 %v4183_v17, %s3702_s28 }
0x19a3   :  { %v2135_v35 = vpop.xlane.xlu0 %2134 }
0x19a4   :  { %v2139_v42 = vsub.f32 %v2131_v26, %v2135_v35 }
0x19a6   :  { %v2141_v60 = vmul.f32 1.442695, %v2139_v42 }
0x19a8   :  { %3640 = vpow2.f32 %v2141_v60 }
0x19ab   :  { %v2138_v43 = vpop.xlane.xlu1 %2137 }
0x19ac   :  { %v2140_v36 = vsub.f32 %v2132_v39, %v2138_v43 }
0x19ae   :  { %v2143_v44 = vmul.f32 1.442695, %v2140_v36 }
0x19af   :  { %v2158_v31 = vpop.permute.xlu1 %2157 }
0x19b0   :  { %3642 = vpow2.f32 %v2143_v44  ;;  %v2163_v45 = vsel %vm393_vm6, %v2158_v31, 0 }
0x19b1   :  { %3387 = vmatpush3.bf16.msra.mxu0 %v2163_v45 }
0x19b2   :  { %v3641_v10 = vpop.eup %3640  ;;  %3398 = vmatprep.subr.bf16.mxu0 %v3690_v50 }
0x19b3   :  { %v2145_v33 = vsel %vm265_vm4, %v3641_v10, 0.0  ;;  %v2256_v9 = vpop.permute.xlu1 %2255 }
0x19b4   :  { %2146 = vadd.xlane.f32.xlu0 %v2145_v33  ;;  %v2261_v54 = vsel %vm265_vm4, %v2256_v9, 0 }
0x19b7   :  { %v2306_v63 = vpop.permute.xlu1 %2305 }
0x19b8   :  { %v2311_v5 = vsel %vm265_vm4, %v2306_v63, 0 }
0x19ba   :  { %v3643_v13 = vpop.eup %3642 }
0x19bb   :  { %v2148_v46 = vsel %vm265_vm4, %v3643_v13, 0.0  ;;  %v2304_v8 = vpop.permute.xlu1 %2303 }
0x19bc   :  { %2149 = vadd.xlane.f32.xlu0 %v2148_v46 }
0x19d2   :  { %2205 = vrot.lane.b32.xlu0 %v4183_v17, %s3700_s26 }
0x19d6   :  { %2253 = vrot.lane.b32.xlu0 %v4181_v59, %s3702_s28 }
0x1a41   :  { %v2147_v47 = vpop.xlane.xlu0 %2146 }
0x1a42   :  { %3644 = vrcp.f32 %v2147_v47 }
0x1a49   :  { %v2150_v48 = vpop.xlane.xlu0 %2149 }
0x1a4a   :  { %3646 = vrcp.f32 %v2150_v48 }
0x1a4c   :  { %v3645_v49 = vpop.eup %3644 }
0x1a4d   :  { %v2153_v3 = vmul.f32 %v3645_v49, %v3641_v10  ;;  %v2206_v7 = vpop.permute.xlu0 %2205 }
0x1a4e   :  { %v2211_v51 = vsel %vm393_vm6, %v2206_v7, 0 }
0x1a4f   :  { %3393 = vmatpush3.bf16.msra.mxu1 %v2211_v51  ;;  %v2155_v52 = vpack.c.bf16 %v2153_v3, %v2153_v3 }
0x1a50   :  { %3404 = vmatprep.subr.bf16.mxu1 %v3690_v50 }
0x1a51   :  { %3389 = vmatmul.mubr.msk.bf16.vlgmr.msra.gmra.mrb[60].mxu0 %vm265_vm4, %v2155_v52  ;;  %v2254_v4 = vpop.permute.xlu0 %2253 }
0x1a52   :  { %3399 = vmatpush3.bf16.xpose.msra.mxu0 %v2261_v54  ;;  %3400 = vmatprep.mubr.msk.bf16.mxu0 %vm3691_vm3, %v3690_v50  ;;  %v3566_v54 = vld [vmem:[%s4475_s4 + $0x10] sm:$0xff]  }
0x1a53   :  { %3410 = vmatprep.subr.bf16.mxu0 %v3690_v50 }
0x1a54   :  { %v3647_v56 = vpop.eup %3646 }
0x1a55   :  { %v2154_v61 = vmul.f32 %v3647_v56, %v3643_v13 }
0x1a57   :  { %v2156_v1 = vpack.c.bf16 %v2154_v61, %v2154_v61  ;;  %v3567_v61 = vld [vmem:[%s4475_s4 + $0x18] sm:$0xff]  }
0x1a59   :  { %3395 = vmatmul.mubr.msk.bf16.vlgmr.msra.gmra.mrb[68].mxu1 %vm265_vm4, %v2156_v1  ;;  %3401 = vmatmul.mubr.msk.bf16.vlgmr.msra.gmra.mrb[64].mxu0 %vm265_vm4, %v2254_v4 }
0x1a5a   :  { %3405 = vmatpush3.bf16.xpose.msra.mxu1 %v2311_v5  ;;  %3406 = vmatprep.mubr.msk.bf16.mxu1 %vm3691_vm3, %v3690_v50 }
0x1a5b   :  { %3416 = vmatprep.subr.bf16.mxu1 %v3690_v50  ;;  %3412 = vmatprep.mubr.msk.bf16.mxu0 %vm3691_vm3, %v3690_v50 }
0x1a61   :  { %3407 = vmatmul.mubr.msk.bf16.vlgmr.msra.gmra.mrb[72].mxu1 %vm265_vm4, %v2304_v8 }
0x1a62   :  { %3418 = vmatprep.mubr.msk.bf16.mxu1 %vm3691_vm3, %v3690_v50 }
0x1b24   :  { %v2199_v12 = vpop.f32.mrb[60].mxu0 }
0x1b25   :  { %v3390_v14 = vpop.f32.mrb[61].mxu0 }
0x1b26   :  { %v2202_v0 = vpop.f32.mrb[62].mxu0 }
0x1b27   :  { %v3391_v19 = vpop.f32.mrb[63].mxu0 }
0x1b2c   :  { %v2247_v21 = vpop.f32.mrb[68].mxu1  ;;  %v2297_v22 = vpop.f32.mrb[64].mxu0 }
0x1b2d   :  { %v3540_v23 = vpack.i.bf16 %v2247_v21, %v2199_v12  ;;  %v2353_v24 = vmul.f32 0.17677669, %v2297_v22  ;;  %v3396_v25 = vpop.f32.mrb[69].mxu1  ;;  %v3402_v62 = vpop.f32.mrb[65].mxu0 }
0x1b2e   :  { %v2250_v26 = vpop.f32.mrb[70].mxu1  ;;  %v2300_v27 = vpop.f32.mrb[66].mxu0 }
0x1b2f   :  { %v3397_v30 = vpop.f32.mrb[71].mxu1  ;;  %v3403_v32 = vpop.f32.mrb[67].mxu0  ;;  %v2355_v28 = vadd.f32 %v2353_v24, %v3896_v20 }
0x1b31   :  { %v2357_v34 = vsel %vm265_vm4, %v2355_v28, -inf }
0x1b32   :  { %2358 = vmax.xlane.f32.xlu0 %v2357_v34 }
0x1b34   :  { %v2347_v37 = vpop.f32.mrb[72].mxu1 }
0x1b35   :  { %v2354_v39 = vmul.f32 0.17677669, %v2347_v37  ;;  %v3408_v40 = vpop.f32.mrb[73].mxu1 }
0x1b36   :  { %v2350_v35 = vpop.f32.mrb[74].mxu1 }
0x1b37   :  { %v3409_v42 = vpop.f32.mrb[75].mxu1  ;;  %v2356_v60 = vadd.f32 %v2354_v39, %v3896_v20 }
0x1b39   :  { %v2360_v43 = vsel %vm265_vm4, %v2356_v60, -inf }
0x1b3a   :  { %2361 = vmax.xlane.f32.xlu1 %v2360_v43 }
0x1b4b   :  { %2381 = vrot.lane.b32.xlu1 %v4181_v59, %s3703_s29 }
0x1b4f   :  { %3536 = vrot.lane.b32.xlu1 %v3535_v18, %s3705_s12 }
0x1b53   :  { %3541 = vrot.lane.b32.xlu1 %v3540_v23, %s3704_s30 }
0x1bbf   :  { %v2359_v36 = vpop.xlane.xlu0 %2358 }
0x1bc0   :  { %v2363_v44 = vsub.f32 %v2355_v28, %v2359_v36 }
0x1bc2   :  { %v2365_v31 = vmul.f32 1.442695, %v2363_v44 }
0x1bc4   :  { %3648 = vpow2.f32 %v2365_v31 }
0x1bc7   :  { %v2362_v45 = vpop.xlane.xlu1 %2361 }
0x1bc8   :  { %v2364_v10 = vsub.f32 %v2356_v60, %v2362_v45 }
0x1bca   :  { %v2367_v20 = vmul.f32 1.442695, %v2364_v10 }
0x1bcb   :  { %v2382_v33 = vpop.permute.xlu1 %2381 }
0x1bcc   :  { %3650 = vpow2.f32 %v2367_v20  ;;  %v2387_v13 = vsel %vm393_vm6, %v2382_v33, 0 }
0x1bcd   :  { %3411 = vmatpush3.bf16.msra.mxu0 %v2387_v13 }
0x1bce   :  { %v3649_v59 = vpop.eup %3648  ;;  %3422 = vmatprep.subr.bf16.mxu0 %v3690_v50 }
0x1bcf   :  { %v2369_v6 = vsel %vm265_vm4, %v3649_v59, 0.0  ;;  %v3537_v19 = vpop.permute.xlu1 %3536 }
0x1bd0   :  { %2370 = vadd.xlane.f32.xlu0 %v2369_v6  ;;  %v3539_v22 = vunpack.i.h.bf16 %v3537_v19  ;;  %v3538_v23 = vunpack.i.l.bf16 %v3537_v19 }
0x1bd2   :  { %v2502_v26 = vsel %vm265_vm4, %v4241_v16, %v3539_v22  ;;  %v2501_v27 = vsel %vm265_vm4, %v4239_v11, %v3538_v23  ;;  %v2516_v11 = vrot.slane %v4170_v53, %v1196_v55 }
0x1bd3   :  { %v3542_v21 = vpop.permute.xlu1 %3541 }
0x1bd4   :  { %v3544_v24 = vunpack.i.h.bf16 %v3542_v21  ;;  %v3543_v25 = vunpack.i.l.bf16 %v3542_v21 }
0x1bd6   :  { %v3651_v15 = vpop.eup %3650  ;;  %v2503_v28 = vsel %vm1183_vm7, %v2501_v27, %v3543_v25  ;;  %v2504_v34 = vsel %vm1183_vm7, %v2502_v26, %v3544_v24  ;;  %v2986_v24 = vld [vmem:[%s4479_s8 + $0x1] ss:$0 sm:$0xff] }
0x1bd7   :  { %v2372_v18 = vsel %vm265_vm4, %v3651_v15, 0.0 }
0x1bd8   :  { %2373 = vadd.xlane.f32.xlu0 %v2372_v18 }
0x1bee   :  { %2429 = vrot.lane.b32.xlu0 %v4183_v17, %s3703_s29 }
0x1c5d   :  { %v2371_v46 = vpop.xlane.xlu0 %2370 }
0x1c5e   :  { %3652 = vrcp.f32 %v2371_v46  ;;  %v3568_v46 = vld [vmem:[%s4476_s5 + $0x10] sm:$0xff]  }
0x1c65   :  { %v2374_v47 = vpop.xlane.xlu0 %2373 }
0x1c66   :  { %3654 = vrcp.f32 %v2374_v47  ;;  %v3569_v47 = vld [vmem:[%s4476_s5 + $0x18] sm:$0xff]  }
0x1c68   :  { %v3653_v48 = vpop.eup %3652 }
0x1c69   :  { %v2377_v49 = vmul.f32 %v3653_v48, %v3649_v59  ;;  %v2430_v3 = vpop.permute.xlu0 %2429  ;;  %v3570_v48 = vld [vmem:[%s4477_s6 + $0x40] sm:$0xff]  }
0x1c6a   :  { %v2435_v7 = vsel %vm393_vm6, %v2430_v3, 0  ;;  %v3572_v3 = vld [vmem:[%s4477_s6 + $0x50] sm:$0xff]  }
0x1c6b   :  { %3417 = vmatpush3.bf16.msra.mxu1 %v2435_v7  ;;  %v2379_v9 = vpack.c.bf16 %v2377_v49, %v2377_v49  ;;  %v3571_v49 = vld [vmem:[%s4477_s6 + $0x48] sm:$0xff]   ;;  %v3573_v7 = vld [vmem:[%s4477_s6 + $0x58] sm:$0xff]  }
0x1c6c   :  { %3430 = vmatprep.subr.bf16.mxu1 %v3690_v50 }
0x1c6d   :  { %3413 = vmatmul.mubr.msk.bf16.vlgmr.msra.gmra.mrb[68].mxu0 %vm265_vm4, %v2379_v9  ;;  %v3574_v9 = vld [vmem:[%s4477_s6 + $0x60] sm:$0xff]  }
0x1c6e   :  { %3426 = vmatprep.mubr.msk.bf16.mxu0 %vm3691_vm3, %v3690_v50  ;;  %3423 = vmatpush3.bf16.msra.mxu0 %v3566_v54 }
0x1c6f   :  { %3424 = vmatprep.subr.bf16.mxu0 %v3690_v50 }
0x1c70   :  { %v3655_v51 = vpop.eup %3654 }
0x1c71   :  { %v2378_v17 = vmul.f32 %v3655_v51, %v3651_v15  ;;  %v3575_v51 = vld [vmem:[%s4477_s6 + $0x68] sm:$0xff]  }
0x1c72   :  { %3425 = vmatpush3.bf16.msra.mxu0 %v3567_v61 }
0x1c73   :  { %v2380_v52 = vpack.c.bf16 %v2378_v17, %v2378_v17  ;;  %3438 = vmatprep.subr.bf16.mxu0 %v3690_v50 }
0x1c75   :  { %3419 = vmatmul.mubr.msk.bf16.vlgmr.msra.gmra.mrb[76].mxu1 %vm265_vm4, %v2380_v52 }
0x1c76   :  { %3434 = vmatprep.mubr.msk.bf16.mxu1 %vm3691_vm3, %v3690_v50  ;;  %3431 = vmatpush3.bf16.msra.mxu1 %v3568_v46 }
0x1c77   :  { %3432 = vmatprep.subr.bf16.mxu1 %v3690_v50 }
0x1c7a   :  { %3433 = vmatpush3.bf16.msra.mxu1 %v3569_v47 }
0x1c7b   :  { %3458 = vmatprep.subr.bf16.mxu1 %v3690_v50 }
0x1d40   :  { %v2423_v56 = vpop.f32.mrb[68].mxu0 }
0x1d41   :  { %v3414_v63 = vpop.f32.mrb[69].mxu0 }
0x1d42   :  { %v2426_v1 = vpop.f32.mrb[70].mxu0 }
0x1d43   :  { %v3415_v4 = vpop.f32.mrb[71].mxu0  ;;  %v2604_v1 = vrot.slane %v4170_v53, %v1284_v57  ;;  %v3576_v57 = vld [vmem:[%s4477_s6 + $0x70] sm:$0xff]  }
0x1d48   :  { %v2471_v5 = vpop.f32.mrb[76].mxu1 }
0x1d49   :  { %v3545_v8 = vpack.i.bf16 %v2471_v5, %v2423_v56  ;;  %v3420_v12 = vpop.f32.mrb[77].mxu1 }
0x1d4a   :  { %v2474_v14 = vpop.f32.mrb[78].mxu1 }
0x1d4b   :  { %3546 = vrot.lane.b32.xlu0 %v3545_v8, %s3706_s15  ;;  %v3421_v0 = vpop.f32.mrb[79].mxu1 }
0x1d4c   :  { %v2610_v0 = vrot.slane %v4170_v53, %v1290_v2  ;;  %v3577_v2 = vld [vmem:[%s4477_s6 + $0x78] sm:$0xff]  }
0x1dbd   :  { %v3547_v62 = vpop.permute.xlu0 %3546 }
0x1dbe   :  { %v3549_v30 = vunpack.i.h.bf16 %v3547_v62  ;;  %v3548_v32 = vunpack.i.l.bf16 %v3547_v62 }
0x1dc0   :  { %v2506_v37 = vsel %vm1186_vm8, %v2504_v34, %v3549_v30  ;;  %v2505_v39 = vsel %vm1186_vm8, %v2503_v28, %v3548_v32 }
0x1dc1   :  { %v2507_v40 = vpack.c.bf16 %v2506_v37, %v2505_v39  ;;  %v2704_v39 = vrot.slane %v4170_v53, %v1382_v29 }
0x1dc3   :  { %3427 = vmatmul.mubr.msk.bf16.vlgmr.msra.gmra.mrb[72].mxu0 %vm156_vm2, %v2507_v40 }
0x1dc4   :  { %3454 = vmatprep.mubr.msk.bf16.mxu0 %vm3691_vm3, %v3690_v50  ;;  %3439 = vmatpush3.bf16.msra.mxu0 %v3570_v48 }
0x1dc5   :  { %3440 = vmatprep.subr.bf16.mxu0 %v3690_v50 }
0x1dc8   :  { %3441 = vmatpush3.bf16.msra.mxu0 %v3571_v49 }
0x1dc9   :  { %3442 = vmatprep.subr.bf16.mxu0 %v3690_v50 }
0x1dcc   :  { %3443 = vmatpush3.bf16.msra.mxu0 %v3572_v3 }
0x1dcd   :  { %3444 = vmatprep.subr.bf16.mxu0 %v3690_v50 }
0x1dd0   :  { %3445 = vmatpush3.bf16.msra.mxu0 %v3573_v7 }
0x1dd1   :  { %3446 = vmatprep.subr.bf16.mxu0 %v3690_v50 }
0x1dd4   :  { %3447 = vmatpush3.bf16.msra.mxu0 %v3574_v9 }
0x1dd5   :  { %3448 = vmatprep.subr.bf16.mxu0 %v3690_v50 }
0x1dd8   :  { %3449 = vmatpush3.bf16.msra.mxu0 %v3575_v51 }
0x1dd9   :  { %3450 = vmatprep.subr.bf16.mxu0 %v3690_v50 }
0x1ddc   :  { %3451 = vmatpush3.bf16.msra.mxu0 %v3576_v57 }
0x1ddd   :  { %3452 = vmatprep.subr.bf16.mxu0 %v3690_v50 }
0x1de0   :  { %3453 = vmatpush3.bf16.msra.mxu0 %v3577_v2 }
0x1e96   :  { %v2566_v16 = vpop.f32.mrb[72].mxu0 }
0x1e97   :  { %v2567_v35 = vadd.f32 %v2566_v16, %v2516_v11  ;;  %v3428_v42 = vpop.f32.mrb[73].mxu0 }
0x1e98   :  { %v2569_v60 = vpop.f32.mrb[74].mxu0 }
0x1e99   :  { %v4374_v43 = vadd.f32 %v2567_v35, %v4146_v38  ;;  %v2570_v36 = vadd.f32 %v2569_v60, %v2516_v11  ;;  %v3429_v44 = vpop.f32.mrb[75].mxu0 }
0x1e9b   :  { %v4377_v31 = vadd.f32 %v2570_v36, %v4149_v41  ;;  %v2575_v45 = vsel %vm156_vm2, %v4374_v43, 0.0 }
0x1e9c   :  { %2576 = vadd.xlane.f32.xlu1 %v2575_v45 }
0x1e9d   :  { %v2578_v10 = vsel %vm156_vm2, %v4377_v31, 0.0 }
0x1e9e   :  { %2579 = vadd.xlane.f32.xlu0 %v2578_v10 }
0x1f29   :  { %v2577_v55 = vpop.xlane.xlu1 %2576 }
0x1f2a   :  { %v2581_v20 = vmul.f32 0.03125, %v2577_v55 }
0x1f2b   :  { %v2580_v33 = vpop.xlane.xlu0 %2579 }
0x1f2c   :  { %v2583_v13 = vsub.f32 %v4374_v43, %v2581_v20  ;;  %v2582_v38 = vmul.f32 0.03125, %v2580_v33 }
0x1f2e   :  { %v2584_v59 = vsub.f32 %v4377_v31, %v2582_v38  ;;  %v2585_v6 = vmul.f32 %v2583_v13, %v2583_v13 }
0x1f30   :  { %v2587_v41 = vsel %vm156_vm2, %v2585_v6, 0.0  ;;  %v2586_v15 = vmul.f32 %v2584_v59, %v2584_v59  ;;  %v3579_v6 = vld [vmem:[%s4480_s9 + $0x8] sm:$0xff]  }
0x1f31   :  { %2588 = vadd.xlane.f32.xlu0 %v2587_v41 }
0x1f32   :  { %v2590_v18 = vsel %vm156_vm2, %v2586_v15, 0.0 }
0x1f33   :  { %2591 = vadd.xlane.f32.xlu1 %v2590_v18 }
0x1fbe   :  { %v2589_v17 = vpop.xlane.xlu0 %2588 }
0x1fbf   :  { %v2593_v52 = vmul.f32 0.03125, %v2589_v17 }
0x1fc0   :  { %v2592_v54 = vpop.xlane.xlu1 %2591 }
0x1fc1   :  { %v2595_v56 = vadd.f32 1e-05, %v2593_v52  ;;  %v2594_v61 = vmul.f32 0.03125, %v2592_v54 }
0x1fc3   :  { %3656 = vrsqrt.f32 %v2595_v56  ;;  %v2596_v63 = vadd.f32 1e-05, %v2594_v61 }
0x1fc5   :  { %3658 = vrsqrt.f32 %v2596_v63 }
0x1fcd   :  { %v3657_v4 = vpop.eup %3656 }
0x1fce   :  { %v2599_v5 = vmul.f32 %v3657_v4, %v2583_v13 }
0x1fcf   :  { %v3659_v8 = vpop.eup %3658 }
0x1fd0   :  { %v2605_v12 = vmul.f32 %v2604_v1, %v2599_v5  ;;  %v2600_v14 = vmul.f32 %v3659_v8, %v2584_v59 }
0x1fd2   :  { %v2606_v19 = vmul.f32 %v2604_v1, %v2600_v14  ;;  %v2611_v21 = vadd.f32 %v2610_v0, %v2605_v12 }
0x1fd4   :  { %v2612_v22 = vadd.f32 %v2610_v0, %v2606_v19 }
0x1fd6   :  { %v2613_v23 = vpack.c.bf16 %v2612_v22, %v2611_v21 }
0x1fd8   :  { %3435 = vmatmul.mubr.msk.bf16.vlgmr.msra.gmra.mrb[80].mxu1 %vm156_vm2, %v2613_v23 }
0x1fd9   :  { %3462 = vmatprep.mubr.msk.bf16.mxu1 %vm3691_vm3, %v3690_v50 }
0x20ab   :  { %v2674_v25 = vpop.f32.mrb[80].mxu1 }
0x20ac   :  { %v2675_v62 = vadd.f32 %v2986_v24, %v2674_v25  ;;  %v3436_v26 = vpop.f32.mrb[81].mxu1 }
0x20ad   :  { %v2677_v27 = vpop.f32.mrb[82].mxu1 }
0x20ae   :  { %v2678_v30 = vadd.f32 %v2986_v24, %v2677_v27  ;;  %v3437_v32 = vpop.f32.mrb[83].mxu1  ;;  %v2681_v28 = vmax.f32 %v2675_v62, 0.0 }
0x20b0   :  { %v2682_v34 = vmax.f32 %v2678_v30, 0.0 }
0x20b2   :  { %v2683_v37 = vpack.c.bf16 %v2682_v34, %v2681_v28 }
0x20b4   :  { %3455 = vmatmul.mubr.bf16.vlgmr.msra.gmra.mrb[76].mxu0 %v2683_v37 }
0x2187   :  { %v2787_v40 = vpop.f32.mrb[76].mxu0 }
0x2188   :  { %v2788_v11 = vadd.f32 %v2787_v40, %v2704_v39  ;;  %v3456_v16 = vpop.f32.mrb[77].mxu0 }
0x2189   :  { %v2790_v35 = vpop.f32.mrb[78].mxu0 }
0x218a   :  { %v2794_v42 = vadd.f32 %v2788_v11, %v4374_v43  ;;  %v2791_v60 = vadd.f32 %v2790_v35, %v2704_v39  ;;  %v3457_v36 = vpop.f32.mrb[79].mxu0 }
0x218c   :  { %v2796_v44 = vsel %vm156_vm2, %v2794_v42, 0.0  ;;  %v2795_v45 = vadd.f32 %v2791_v60, %v4377_v31  ;;  %v3578_v31 = vld [vmem:[%s4480_s9] sm:$0xff]   ;;  %s3707_s9 = smov [#allocation2]  }
0x218d   :  { %2797 = vadd.xlane.f32.xlu0 %v2796_v44  ;;  %3459 = vmatpush3.bf16.msra.mxu1 %v3578_v31  ;;  %s2897_s21 = sshll.u32 %s3707_s9, 4  ;;  %s2898_s21 = int_to_ptr.vmem [resolvable:$true] %s2897_s21 }
0x218e   :  { %v2799_v10 = vsel %vm156_vm2, %v2795_v45, 0.0  ;;  %3460 = vmatprep.subr.bf16.mxu1 %v3690_v50  ;;  %v3014_v50 = vld [vmem:[%s4481_s10] ss:$0 sm:$0xff]  ;;  %s3664_s22 = scalar_lea.vmem %s2898_s21, 256  ;;  %p3669_p1 = scmp.lt.s32.totalorder %s2898_s21, %s2898_s21 }
0x218f   :  { %2800 = vadd.xlane.f32.xlu1 %v2799_v10  ;;  %p3665_p0 = scmp.ne.s32.totalorder %s2898_s21, %s3664_s22  ;;  %p3670_p2 = scmp.lt.s32.totalorder %s3664_s22, %s3664_s22 }
0x2191   :  { %3461 = vmatpush3.bf16.msra.mxu1 %v3579_v6  ;;  %p3671_p3 = por %p3670_p2, %p3669_p1 }
0x2193   :  { %p3672_p4 = pnand %p3671_p3, %p3665_p0 }
0x221a   :  { %v2798_v55 = vpop.xlane.xlu0 %2797 }
0x221b   :  { %v2802_v58 = vmul.f32 0.03125, %v2798_v55 }
0x221c   :  { %v2801_v20 = vpop.xlane.xlu1 %2800 }
0x221d   :  { %v2804_v29 = vsub.f32 %v2794_v42, %v2802_v58  ;;  %v2803_v53 = vmul.f32 0.03125, %v2801_v20 }
0x221f   :  { %v2805_v33 = vsub.f32 %v2795_v45, %v2803_v53  ;;  %v2806_v13 = vmul.f32 %v2804_v29, %v2804_v29 }
0x2221   :  { %v2808_v38 = vsel %vm156_vm2, %v2806_v13, 0.0  ;;  %v2807_v43 = vmul.f32 %v2805_v33, %v2805_v33 }
0x2222   :  { %2809 = vadd.xlane.f32.xlu0 %v2808_v38 }
0x2223   :  { %v2811_v59 = vsel %vm156_vm2, %v2807_v43, 0.0 }
0x2224   :  { %2812 = vadd.xlane.f32.xlu1 %v2811_v59 }
0x22af   :  { %v2810_v41 = vpop.xlane.xlu0 %2809 }
0x22b0   :  { %v2814_v15 = vmul.f32 0.03125, %v2810_v41 }
0x22b1   :  { %v2813_v18 = vpop.xlane.xlu1 %2812 }
0x22b2   :  { %v2816_v46 = vadd.f32 1e-05, %v2814_v15  ;;  %v2815_v47 = vmul.f32 0.03125, %v2813_v18 }
0x22b4   :  { %3660 = vrsqrt.f32 %v2816_v46  ;;  %v2817_v48 = vadd.f32 1e-05, %v2815_v47 }
0x22b6   :  { %3662 = vrsqrt.f32 %v2817_v48 }
0x22be   :  { %v3661_v49 = vpop.eup %3660 }
0x22bf   :  { %v2820_v7 = vmul.f32 %v3661_v49, %v2804_v29 }
0x22c0   :  { %v3663_v3 = vpop.eup %3662 }
0x22c1   :  { %v2821_v9 = vmul.f32 %v3663_v3, %v2805_v33 }
0x22c3   :  { %v2822_v51 = vpack.c.bf16 %v2821_v9, %v2820_v7 }
0x22c5   :  { %3463 = vmatmul.mubr.msk.bf16.vlgmr.msra.gmra.mrb[84].mxu1 %vm156_vm2, %v2822_v51 }
0x2398   :  { %v2883_v17 = vpop.f32.mrb[84].mxu1 }
0x2399   :  { %v2884_v52 = vadd.f32 %v3014_v50, %v2883_v17  ;;  %v3464_v54 = vpop.f32.mrb[85].mxu1 }
0x239a   :  { %v2886_v56 = vpop.f32.mrb[86].mxu1 }
0x239b   :  { %2890 = vst [vmem:[#allocation2] sm:$0xff] %v2884_v52  ;;  %v2887_v61 = vadd.f32 %v3014_v50, %v2886_v56  ;;  %v3465_v63 = vpop.f32.mrb[87].mxu1 }
0x239d   :  { %2891 = vst [vmem:[#allocation2 + $0x8] sm:$0xff] %v2887_v61 }
0x239e   :  { %3675 = shalt.err (!%p3672_p4)
}
0x239f   :  { %s3676_s24 = scalar_lea.hbm %s4482_s11, 256 }
0x23a0   :  { %p3677_p5 = scmp.ne.s32.totalorder %s4482_s11, %s3676_s24  ;;  %p3680_p6 = scmp.lt.u32.totalorder %s3676_s24, %s4482_s11 }
0x23a2   :  { %p3682_p7 = pnand %p3680_p6, %p3677_p5 }
0x23a4   :  { %3685 = shalt.err (!%p3682_p7)
}
0x23a5   :  { %s3708_s29 = smov 128  }
0x23a6   :  { %2903 = dma.vmem_to_hbm [thread:$0]  %s2898_s21, 256, %s4482_s11, [#allocation3], %s3708_s29, %s3708_s29, %s3705_s12  }
0x23a7   :  { %3686 = dma.done.wait [#allocation3], 256  }
0x23a8   :  { %3687 = vsyncadd [#allocation3], 4294967040 }
0x23a9   :  { %2907 = vsyncpa [#allocation3], 1 }

</bundles_post_ra>
